<compile_context>
chip_gen: v7x
topology: tpu7x:2x2x1
jax: 0.10.0
libtpu: 0.0.40
codegen_flags: <defaults>
</compile_context>

<pallas_src>
import functools

import jax
import jax.numpy as jnp
from jax.experimental import pallas as pl
from jax.experimental.pallas import tpu as pltpu

ALPHA = 0.5
SCALES = 4

_SUBLANE = 8
_LANE = 128


def _round_up(x, m):
    return ((x + m - 1) // m) * m


def _shift_up(x, axis):
    """shifted[..., i, ...] = x[..., i + 1, ...] (with wrap-around).

    Wrapped-in elements are always excluded by the per-scale edge weights in the
    caller (and/or multiply a zero mask), so the wrap never contributes.
    """
    n = x.shape[axis]
    return pltpu.roll(x, shift=n - 1, axis=axis)


def _ssi_stats_kernel(pred_ref, targ_ref, out_ref, *, scales, h_orig, w_orig):
    # pred_ref / targ_ref: (1, H_pad, W_pad) block of the current batch element.
    # out_ref: (1, ROWS_PAD, W_pad) f32 column-partial statistics:
    #   row 0              : masked-MSE numerator partials
    #   row 1              : mask partials (-> M = a_11; also grad mask count, scale 0)
    #   row 2 + s          : gradient numerator partials, scale s
    #   row 1 + scales + s : gradient mask-count partials, scale s (s >= 1 only)
    p = pred_ref[0].astype(jnp.float32)   # (H_pad, W_pad)
    t = targ_ref[0].astype(jnp.float32)
    H, W = p.shape

    # Downsampled scales only fill the first w_cur lanes of their rows; the rest
    # (and the padding rows) must be zero for the glue-side jnp.sum.
    out_ref[...] = jnp.zeros_like(out_ref)

    def colsum(x, ones_row):
        # axis-0 reduction on the (otherwise idle) MXU: (1, h) @ (h, w) -> (w,)
        return jnp.dot(ones_row, x, preferred_element_type=jnp.float32)[0]

    ones_full = jnp.ones((1, H), jnp.float32)

    mask = (t > 0).astype(jnp.float32)
    mp = mask * p

    # ---- per-image 2x2 least squares (compute_scale_and_shift) ----
    col_a00 = colsum(mp * p, ones_full)
    col_a01 = colsum(mp, ones_full)
    col_a11 = colsum(mask, ones_full)
    col_b0 = colsum(mp * t, ones_full)
    col_b1 = colsum(mask * t, ones_full)

    a00 = jnp.sum(col_a00)
    a01 = jnp.sum(col_a01)
    a11 = jnp.sum(col_a11)
    b0 = jnp.sum(col_b0)
    b1 = jnp.sum(col_b1)

    det = a00 * a11 - a01 * a01
    nz = det != 0
    safe_det = jnp.where(nz, det, 1.0)
    scale = jnp.where(nz, (a11 * b0 - a01 * b1) / safe_det, 0.0)
    shift = jnp.where(nz, (-a01 * b0 + a00 * b1) / safe_det, 0.0)

    # ---- prediction_ssi residual and masked-MSE partials ----
    r = scale * p + shift - t            # p_ssi - target
    diff = mask * r                      # mask * (p_ssi - target); mask is 0/1
    out_ref[0, 0, :] = colsum(diff * r, ones_full)   # = sum(mask * res * res, axis=0)
    out_ref[0, 1, :] = col_a11

    # ---- multi-scale gradient loss on a hierarchically downsampled pyramid ----
    d_cur, m_cur = diff, mask
    h_cur, w_cur = H, W
    h_val, w_val = h_orig, w_orig        # valid (reference subsample) extent
    for s in range(scales):
        row_i = jax.lax.broadcasted_iota(jnp.int32, (h_cur, w_cur), 0)
        col_i = jax.lax.broadcasted_iota(jnp.int32, (h_cur, w_cur), 1)

        # x-gradient: pairs (c, c+1) of the subsampled grid, both inside w_val.
        d_x = _shift_up(d_cur, axis=1)
        m_x = _shift_up(m_cur, axis=1)
        gx = jnp.abs(d_x - d_cur) * jnp.where(col_i < (w_val - 1), m_cur * m_x, 0.0)

        # y-gradient: pairs (r, r+1) of the subsampled grid, both inside h_val.
        d_y = _shift_up(d_cur, axis=0)
        m_y = _shift_up(m_cur, axis=0)
        gy = jnp.abs(d_y - d_cur) * jnp.where(row_i < (h_val - 1), m_cur * m_y, 0.0)

        ones_s = jnp.ones((1, h_cur), jnp.float32)
        out_ref[0, 2 + s, 0:w_cur] = colsum(gx + gy, ones_s)
        if s > 0:
            out_ref[0, 1 + scales + s, 0:w_cur] = colsum(m_cur, ones_s)

        if s + 1 < scales:
            # 2x downsample of diff/mask via 0/1 selection matmuls on the MXU:
            # column matrix picks x[:, 2j], row matrix picks x[2i, :].  Output
            # shapes stay (8,128)-aligned; out-of-range rows/cols are exactly 0
            # (they behave like mask==0 padding at the next scale).
            h_next = max(_SUBLANE, _round_up((h_cur + 1) // 2, _SUBLANE))
            w_next = max(_LANE, _round_up((w_cur + 1) // 2, _LANE))

            ci = jax.lax.broadcasted_iota(jnp.int32, (w_cur, w_next), 0)
            cj = jax.lax.broadcasted_iota(jnp.int32, (w_cur, w_next), 1)
            sel_c = (ci == 2 * cj).astype(jnp.float32)          # (w_cur, w_next)
            ri = jax.lax.broadcasted_iota(jnp.int32, (h_next, h_cur), 0)
            rj = jax.lax.broadcasted_iota(jnp.int32, (h_next, h_cur), 1)
            sel_r = (rj == 2 * ri).astype(jnp.float32)          # (h_next, h_cur)

            d_cur = jnp.dot(sel_r,
                            jnp.dot(d_cur, sel_c, preferred_element_type=jnp.float32),
                            preferred_element_type=jnp.float32)
            m_cur = jnp.dot(sel_r,
                            jnp.dot(m_cur, sel_c, preferred_element_type=jnp.float32),
                            preferred_element_type=jnp.float32)
            h_cur, w_cur = h_next, w_next
            h_val = (h_val + 1) // 2
            w_val = (w_val + 1) // 2


def _pick_vmem_limit(h_pad, w_pad, rows, itemsize):
    img = h_pad * w_pad
    # double-buffered inputs + worst-case live f32 temporaries + output blocks
    est = 2 * 2 * img * itemsize + 14 * img * 4 + 4 * rows * w_pad * 4
    cap = 64 * 1024 * 1024
    try:
        cap = int(getattr(pltpu.get_tpu_info(), "vmem_capacity_bytes", cap))
    except Exception:
        pass
    return int(max(32 * 1024 * 1024, min(est, int(cap * 0.9))))


def scale_and_shift_invariant_loss(prediction, target, alpha=ALPHA, scales=SCALES):
    # Inputs may be f32 or bf16 (bf16 halves HBM traffic); compute is f32.
    B, H, W = prediction.shape

    # Pad spatial dims to (8, 128) multiples so all tiles / rolls / matmuls are
    # sublane/lane dense.  target padded with zeros -> mask == 0 there.
    H_pad = _round_up(H, _SUBLANE)
    W_pad = _round_up(W, _LANE)
    if (H_pad, W_pad) != (H, W):
        pad_cfg = ((0, 0), (0, H_pad - H), (0, W_pad - W))
        prediction = jnp.pad(prediction, pad_cfg)
        target = jnp.pad(target, pad_cfg)

    rows = _round_up(2 + 2 * scales - 1, 16)   # pad stats rows for a dense vst tile
    itemsize = jnp.dtype(prediction.dtype).itemsize
    vmem_limit = _pick_vmem_limit(H_pad, W_pad, rows, itemsize)

    kernel = functools.partial(_ssi_stats_kernel, scales=scales, h_orig=H, w_orig=W)

    stats = pl.pallas_call(
        kernel,
        out_shape=jax.ShapeDtypeStruct((B, rows, W_pad), jnp.float32),
        grid=(B,),
        in_specs=[
            pl.BlockSpec((1, H_pad, W_pad), lambda b: (b, 0, 0)),
            pl.BlockSpec((1, H_pad, W_pad), lambda b: (b, 0, 0)),
        ],
        out_specs=pl.BlockSpec((1, rows, W_pad), lambda b: (b, 0, 0)),
        compiler_params=pltpu.CompilerParams(
            dimension_semantics=("parallel",),
            vmem_limit_bytes=vmem_limit,
        ),
    )(prediction, target)

    # Batch-based reduction: everything is summed over batch (and lanes) anyway,
    # so finish the lane reductions here with plain XLA ops.
    totals = jnp.sum(stats, axis=(0, 2))  # (rows,)

    def safe_div(num, den):
        return jnp.where(den == 0, 0.0, num / jnp.where(den == 0, 1.0, den))

    mse_num = totals[0]
    m_sum = totals[1]
    total = safe_div(mse_num, 2.0 * m_sum)

    if alpha > 0:
        reg = safe_div(totals[2], m_sum)   # scale 0: gradient mask count == a_11 sum
        for s in range(1, scales):
            reg = reg + safe_div(totals[2 + s], totals[1 + scales + s])
        total = total + alpha * reg
    return total


# ----------------- pure-JAX reference (direct port of the PyTorch code) -----------------
def _reference_loss(prediction, target, alpha=ALPHA, scales=SCALES):
    mask = (target > 0).astype(jnp.float32)

    def s12(x):
        return jnp.sum(x, axis=(1, 2))

    a_00 = s12(mask * prediction * prediction)
    a_01 = s12(mask * prediction)
    a_11 = s12(mask)
    b_0 = s12(mask * prediction * target)
    b_1 = s12(mask * target)
    det = a_00 * a_11 - a_01 * a_01
    safe = jnp.where(det != 0, det, 1.0)
    x_0 = jnp.where(det != 0, (a_11 * b_0 - a_01 * b_1) / safe, 0.0)
    x_1 = jnp.where(det != 0, (-a_01 * b_0 + a_00 * b_1) / safe, 0.0)
    p_ssi = x_0[:, None, None] * prediction + x_1[:, None, None]

    res = p_ssi - target
    image_loss = s12(mask * res * res)
    div = jnp.sum(2.0 * a_11)
    total = jnp.where(div == 0, 0.0, jnp.sum(image_loss) / jnp.where(div == 0, 1.0, div))

    for s in range(scales):
        step = 2 ** s
        p = p_ssi[:, ::step, ::step]
        t = target[:, ::step, ::step]
        m = mask[:, ::step, ::step]
        M = s12(m)
        diff = m * (p - t)
        gx = jnp.abs(diff[:, :, 1:] - diff[:, :, :-1]) * m[:, :, 1:] * m[:, :, :-1]
        gy = jnp.abs(diff[:, 1:, :] - diff[:, :-1, :]) * m[:, 1:, :] * m[:, :-1, :]
        il = s12(gx) + s12(gy)
        d = jnp.sum(M)
        total = total + alpha * jnp.where(d == 0, 0.0, jnp.sum(il) / jnp.where(d == 0, 1.0, d))
    return total


if __name__ == "__main__":
    key = jax.random.PRNGKey(0)
    k1, k2, k3, k4 = jax.random.split(key, 4)

    # Tolerance note: all reductions and the 2x-downsample now run through the
    # MXU (f32 matmul passes), so accumulation order / pass decomposition differs
    # slightly from the pure-XLA reference.
    TOL = 5e-3

    # Case 1: small square maps (H multiple of 8, W padded to 128).
    B, H, W = 2, 16, 16
    prediction = jax.random.normal(k1, (B, H, W), dtype=jnp.float32)
    # normal target -> roughly half the pixels have target <= 0, exercising the mask path
    target = jax.random.normal(k2, (B, H, W), dtype=jnp.float32)

    loss = jax.block_until_ready(scale_and_shift_invariant_loss(prediction, target))
    ref = _reference_loss(prediction, target)
    assert jnp.allclose(loss, ref, atol=TOL, rtol=TOL), (float(loss), float(ref))

    # Case 2: non-aligned H/W and odd batch, exercising the zero-padding path
    # and non-trivial valid extents at every pyramid level.
    B2, H2, W2 = 3, 12, 40
    prediction2 = jax.random.normal(k3, (B2, H2, W2), dtype=jnp.float32)
    target2 = jax.random.normal(k4, (B2, H2, W2), dtype=jnp.float32)

    loss2 = jax.block_until_ready(scale_and_shift_invariant_loss(prediction2, target2))
    ref2 = _reference_loss(prediction2, target2)
    assert jnp.allclose(loss2, ref2, atol=TOL, rtol=TOL), (float(loss2), float(ref2))

    print("KERNEL_OK")
</pallas_src>

<mosaic_0001>
module attributes {stable_mosaic.version = 11 : i64} {
  func.func @_ssi_stats_kernel(%arg0: i32, %arg1: memref<1x16x128xf32, #tpu.memory_space<vmem>>, %arg2: memref<1x16x128xf32, #tpu.memory_space<vmem>>, %arg3: memref<1x16x128xf32, #tpu.memory_space<vmem>>) attributes {dimension_semantics = [#tpu.dimension_semantics<parallel>], iteration_bounds = array<i64: 2>, scalar_prefetch = 0 : i64, scratch_operands = 0 : i64, tpu.core_type = #tpu.core_type<tc>, window_params = [{transform_indices = @transform_0, window_bounds = array<i64: 1, 16, 128>}, {transform_indices = @transform_1, window_bounds = array<i64: 1, 16, 128>}, {transform_indices = @transform_2, window_bounds = array<i64: 1, 16, 128>}]} {
    %c0 = arith.constant 0 : index
    %c0_0 = arith.constant 0 : index
    %c0_1 = arith.constant 0 : index
    %0 = vector.load %arg1[%c0, %c0_0, %c0_1] : memref<1x16x128xf32, #tpu.memory_space<vmem>>, vector<1x16x128xf32>
    %1 = vector.shape_cast %0 : vector<1x16x128xf32> to vector<16x128xf32>
    %c0_2 = arith.constant 0 : index
    %c0_3 = arith.constant 0 : index
    %c0_4 = arith.constant 0 : index
    %2 = vector.load %arg2[%c0_2, %c0_3, %c0_4] : memref<1x16x128xf32, #tpu.memory_space<vmem>>, vector<1x16x128xf32>
    %3 = vector.shape_cast %2 : vector<1x16x128xf32> to vector<16x128xf32>
    %cst = arith.constant 0.000000e+00 : f32
    %4 = vector.broadcast %cst : f32 to vector<1x16x128xf32>
    %c0_5 = arith.constant 0 : index
    %c0_6 = arith.constant 0 : index
    %c0_7 = arith.constant 0 : index
    %5 = vector.load %arg3[%c0_5, %c0_6, %c0_7] : memref<1x16x128xf32, #tpu.memory_space<vmem>>, vector<1x16x128xf32>
    tpu.vector_store %arg3[%c0_5, %c0_6, %c0_7], %4 {strides = array<i32>} : memref<1x16x128xf32, #tpu.memory_space<vmem>>, vector<1x16x128xf32>,
    %cst_8 = arith.constant 1.000000e+00 : f32
    %6 = vector.broadcast %cst_8 : f32 to vector<1x16xf32>
    %cst_9 = arith.constant 0.000000e+00 : f32
    %7 = vector.broadcast %cst_9 : f32 to vector<16x128xf32>
    %8 = arith.cmpf ogt, %3, %7 : vector<16x128xf32>
    %9 = arith.extui %8 : vector<16x128xi1> to vector<16x128xi32>
    %10 = arith.sitofp %9 : vector<16x128xi32> to vector<16x128xf32>
    %11 = arith.mulf %10, %1 : vector<16x128xf32>
    %12 = arith.mulf %11, %1 : vector<16x128xf32>
    %cst_10 = arith.constant dense<0.000000e+00> : vector<1x128xf32>
    %13 = tpu.matmul %6, %12, %cst_10 {dimension_numbers = #tpu.dot_dimension_numbers<[1], [0], [0], [1], [0, 0, 1, 1], [], []>} : vector<1x16xf32>, vector<16x128xf32>, vector<1x128xf32> -> vector<1x128xf32>
    %14 = vector.shape_cast %13 : vector<1x128xf32> to vector<128xf32>
    %cst_11 = arith.constant dense<0.000000e+00> : vector<1x128xf32>
    %15 = tpu.matmul %6, %11, %cst_11 {dimension_numbers = #tpu.dot_dimension_numbers<[1], [0], [0], [1], [0, 0, 1, 1], [], []>} : vector<1x16xf32>, vector<16x128xf32>, vector<1x128xf32> -> vector<1x128xf32>
    %16 = vector.shape_cast %15 : vector<1x128xf32> to vector<128xf32>
    %cst_12 = arith.constant dense<0.000000e+00> : vector<1x128xf32>
    %17 = tpu.matmul %6, %10, %cst_12 {dimension_numbers = #tpu.dot_dimension_numbers<[1], [0], [0], [1], [0, 0, 1, 1], [], []>} : vector<1x16xf32>, vector<16x128xf32>, vector<1x128xf32> -> vector<1x128xf32>
    %18 = vector.shape_cast %17 : vector<1x128xf32> to vector<128xf32>
    %19 = arith.mulf %11, %3 : vector<16x128xf32>
    %cst_13 = arith.constant dense<0.000000e+00> : vector<1x128xf32>
    %20 = tpu.matmul %6, %19, %cst_13 {dimension_numbers = #tpu.dot_dimension_numbers<[1], [0], [0], [1], [0, 0, 1, 1], [], []>} : vector<1x16xf32>, vector<16x128xf32>, vector<1x128xf32> -> vector<1x128xf32>
    %21 = vector.shape_cast %20 : vector<1x128xf32> to vector<128xf32>
    %22 = arith.mulf %10, %3 : vector<16x128xf32>
    %cst_14 = arith.constant dense<0.000000e+00> : vector<1x128xf32>
    %23 = tpu.matmul %6, %22, %cst_14 {dimension_numbers = #tpu.dot_dimension_numbers<[1], [0], [0], [1], [0, 0, 1, 1], [], []>} : vector<1x16xf32>, vector<16x128xf32>, vector<1x128xf32> -> vector<1x128xf32>
    %24 = vector.shape_cast %23 : vector<1x128xf32> to vector<128xf32>
    %25 = vector.shape_cast %14 : vector<128xf32> to vector<1x128xf32>
    %cst_15 = arith.constant dense<0.000000e+00> : vector<1xf32>
    %26 = vector.multi_reduction <add>, %25, %cst_15 [1] : vector<1x128xf32> to vector<1xf32>
    %27 = vector.shape_cast %26 : vector<1xf32> to vector<1x1xf32>
    %28 = vector.extract %27[0, 0] : f32 from vector<1x1xf32>
    %29 = vector.shape_cast %16 : vector<128xf32> to vector<1x128xf32>
    %cst_16 = arith.constant dense<0.000000e+00> : vector<1xf32>
    %30 = vector.multi_reduction <add>, %29, %cst_16 [1] : vector<1x128xf32> to vector<1xf32>
    %31 = vector.shape_cast %30 : vector<1xf32> to vector<1x1xf32>
    %32 = vector.extract %31[0, 0] : f32 from vector<1x1xf32>
    %33 = vector.shape_cast %18 : vector<128xf32> to vector<1x128xf32>
    %cst_17 = arith.constant dense<0.000000e+00> : vector<1xf32>
    %34 = vector.multi_reduction <add>, %33, %cst_17 [1] : vector<1x128xf32> to vector<1xf32>
    %35 = vector.shape_cast %34 : vector<1xf32> to vector<1x1xf32>
    %36 = vector.extract %35[0, 0] : f32 from vector<1x1xf32>
    %37 = vector.shape_cast %21 : vector<128xf32> to vector<1x128xf32>
    %cst_18 = arith.constant dense<0.000000e+00> : vector<1xf32>
    %38 = vector.multi_reduction <add>, %37, %cst_18 [1] : vector<1x128xf32> to vector<1xf32>
    %39 = vector.shape_cast %38 : vector<1xf32> to vector<1x1xf32>
    %40 = vector.extract %39[0, 0] : f32 from vector<1x1xf32>
    %41 = vector.shape_cast %24 : vector<128xf32> to vector<1x128xf32>
    %cst_19 = arith.constant dense<0.000000e+00> : vector<1xf32>
    %42 = vector.multi_reduction <add>, %41, %cst_19 [1] : vector<1x128xf32> to vector<1xf32>
    %43 = vector.shape_cast %42 : vector<1xf32> to vector<1x1xf32>
    %44 = vector.extract %43[0, 0] : f32 from vector<1x1xf32>
    %45 = arith.mulf %28, %36 : f32
    %46 = arith.mulf %32, %32 : f32
    %47 = arith.subf %45, %46 : f32
    %cst_20 = arith.constant 0.000000e+00 : f32
    %48 = arith.cmpf one, %47, %cst_20 : f32
    %cst_21 = arith.constant 1.000000e+00 : f32
    %49 = arith.select %48, %47, %cst_21 : f32
    %50 = arith.mulf %36, %40 : f32
    %51 = arith.mulf %32, %44 : f32
    %52 = arith.subf %50, %51 : f32
    %53 = arith.divf %52, %49 : f32
    %cst_22 = arith.constant 0.000000e+00 : f32
    %54 = arith.select %48, %53, %cst_22 : f32
    %cst_23 = arith.constant 0.000000e+00 : f32
    %55 = arith.subf %cst_23, %32 : f32
    %56 = arith.mulf %55, %40 : f32
    %57 = arith.mulf %28, %44 : f32
    %58 = arith.addf %56, %57 : f32
    %59 = arith.divf %58, %49 : f32
    %cst_24 = arith.constant 0.000000e+00 : f32
    %60 = arith.select %48, %59, %cst_24 : f32
    %61 = vector.broadcast %54 : f32 to vector<16x128xf32>
    %62 = arith.mulf %61, %1 : vector<16x128xf32>
    %63 = vector.broadcast %60 : f32 to vector<16x128xf32>
    %64 = arith.addf %62, %63 : vector<16x128xf32>
    %65 = arith.subf %64, %3 : vector<16x128xf32>
    %66 = arith.mulf %10, %65 : vector<16x128xf32>
    %67 = arith.mulf %66, %65 : vector<16x128xf32>
    %cst_25 = arith.constant dense<0.000000e+00> : vector<1x128xf32>
    %68 = tpu.matmul %6, %67, %cst_25 {dimension_numbers = #tpu.dot_dimension_numbers<[1], [0], [0], [1], [0, 0, 1, 1], [], []>} : vector<1x16xf32>, vector<16x128xf32>, vector<1x128xf32> -> vector<1x128xf32>
    %69 = vector.shape_cast %68 : vector<1x128xf32> to vector<128xf32>
    %c0_26 = arith.constant 0 : index
    %c0_27 = arith.constant 0 : index
    %c0_28 = arith.constant 0 : index
    %70 = vector.load %arg3[%c0_26, %c0_27, %c0_28] : memref<1x16x128xf32, #tpu.memory_space<vmem>>, vector<1x1x128xf32>
    %71 = vector.shape_cast %70 : vector<1x1x128xf32> to vector<128xf32>
    %72 = vector.shape_cast %69 : vector<128xf32> to vector<1x1x128xf32>
    tpu.vector_store %arg3[%c0_26, %c0_27, %c0_28], %72 {strides = array<i32>} : memref<1x16x128xf32, #tpu.memory_space<vmem>>, vector<1x1x128xf32>,
    %c0_29 = arith.constant 0 : index
    %c1 = arith.constant 1 : index
    %c0_30 = arith.constant 0 : index
    %73 = vector.load %arg3[%c0_29, %c1, %c0_30] : memref<1x16x128xf32, #tpu.memory_space<vmem>>, vector<1x1x128xf32>
    %74 = vector.shape_cast %73 : vector<1x1x128xf32> to vector<128xf32>
    %75 = vector.shape_cast %18 : vector<128xf32> to vector<1x1x128xf32>
    tpu.vector_store %arg3[%c0_29, %c1, %c0_30], %75 {strides = array<i32>} : memref<1x16x128xf32, #tpu.memory_space<vmem>>, vector<1x1x128xf32>,
    %76 = tpu.iota {dimensions = array<i32: 0>} : vector<16x128xi32>
    %77 = tpu.iota {dimensions = array<i32: 1>} : vector<16x128xi32>
    %c127_i32 = arith.constant 127 : i32
    %78 = tpu.dynamic_rotate %66 by %c127_i32 dim 1 : vector<16x128xf32>, i32 -> vector<16x128xf32>
    %c127_i32_31 = arith.constant 127 : i32
    %79 = tpu.dynamic_rotate %10 by %c127_i32_31 dim 1 : vector<16x128xf32>, i32 -> vector<16x128xf32>
    %80 = arith.subf %78, %66 : vector<16x128xf32>
    %81 = math.absf %80 : vector<16x128xf32>
    %c15_i32 = arith.constant 15 : i32
    %82 = vector.broadcast %c15_i32 : i32 to vector<16x128xi32>
    %83 = arith.cmpi slt, %77, %82 : vector<16x128xi32>
    %84 = arith.mulf %10, %79 : vector<16x128xf32>
    %cst_32 = arith.constant 0.000000e+00 : f32
    %85 = vector.broadcast %cst_32 : f32 to vector<16x128xf32>
    %86 = arith.select %83, %84, %85 : vector<16x128xi1>, vector<16x128xf32>
    %87 = arith.mulf %81, %86 : vector<16x128xf32>
    %c15_i32_33 = arith.constant 15 : i32
    %88 = tpu.dynamic_rotate %66 by %c15_i32_33 dim 0 : vector<16x128xf32>, i32 -> vector<16x128xf32>
    %c15_i32_34 = arith.constant 15 : i32
    %89 = tpu.dynamic_rotate %10 by %c15_i32_34 dim 0 : vector<16x128xf32>, i32 -> vector<16x128xf32>
    %90 = arith.subf %88, %66 : vector<16x128xf32>
    %91 = math.absf %90 : vector<16x128xf32>
    %c15_i32_35 = arith.constant 15 : i32
    %92 = vector.broadcast %c15_i32_35 : i32 to vector<16x128xi32>
    %93 = arith.cmpi slt, %76, %92 : vector<16x128xi32>
    %94 = arith.mulf %10, %89 : vector<16x128xf32>
    %cst_36 = arith.constant 0.000000e+00 : f32
    %95 = vector.broadcast %cst_36 : f32 to vector<16x128xf32>
    %96 = arith.select %93, %94, %95 : vector<16x128xi1>, vector<16x128xf32>
    %97 = arith.mulf %91, %96 : vector<16x128xf32>
    %cst_37 = arith.constant 1.000000e+00 : f32
    %98 = vector.broadcast %cst_37 : f32 to vector<1x16xf32>
    %99 = arith.addf %87, %97 : vector<16x128xf32>
    %cst_38 = arith.constant dense<0.000000e+00> : vector<1x128xf32>
    %100 = tpu.matmul %98, %99, %cst_38 {dimension_numbers = #tpu.dot_dimension_numbers<[1], [0], [0], [1], [0, 0, 1, 1], [], []>} : vector<1x16xf32>, vector<16x128xf32>, vector<1x128xf32> -> vector<1x128xf32>
    %101 = vector.shape_cast %100 : vector<1x128xf32> to vector<128xf32>
    %c0_39 = arith.constant 0 : index
    %c2 = arith.constant 2 : index
    %c0_40 = arith.constant 0 : index
    %102 = vector.load %arg3[%c0_39, %c2, %c0_40] : memref<1x16x128xf32, #tpu.memory_space<vmem>>, vector<1x1x128xf32>
    %103 = vector.shape_cast %102 : vector<1x1x128xf32> to vector<128xf32>
    %104 = vector.shape_cast %101 : vector<128xf32> to vector<1x1x128xf32>
    tpu.vector_store %arg3[%c0_39, %c2, %c0_40], %104 {strides = array<i32>} : memref<1x16x128xf32, #tpu.memory_space<vmem>>, vector<1x1x128xf32>,
    %105 = tpu.iota {dimensions = array<i32: 0>} : vector<128x128xi32>
    %106 = tpu.iota {dimensions = array<i32: 1>} : vector<128x128xi32>
    %c2_i32 = arith.constant 2 : i32
    %107 = vector.broadcast %c2_i32 : i32 to vector<128x128xi32>
    %108 = arith.muli %107, %106 : vector<128x128xi32>
    %109 = arith.cmpi eq, %105, %108 : vector<128x128xi32>
    %110 = arith.extui %109 : vector<128x128xi1> to vector<128x128xi32>
    %111 = arith.sitofp %110 : vector<128x128xi32> to vector<128x128xf32>
    %112 = tpu.iota {dimensions = array<i32: 0>} : vector<8x16xi32>
    %113 = tpu.iota {dimensions = array<i32: 1>} : vector<8x16xi32>
    %c2_i32_41 = arith.constant 2 : i32
    %114 = vector.broadcast %c2_i32_41 : i32 to vector<8x16xi32>
    %115 = arith.muli %114, %112 : vector<8x16xi32>
    %116 = arith.cmpi eq, %113, %115 : vector<8x16xi32>
    %117 = arith.extui %116 : vector<8x16xi1> to vector<8x16xi32>
    %118 = arith.sitofp %117 : vector<8x16xi32> to vector<8x16xf32>
    %cst_42 = arith.constant dense<0.000000e+00> : vector<16x128xf32>
    %119 = tpu.matmul %66, %111, %cst_42 {dimension_numbers = #tpu.dot_dimension_numbers<[1], [0], [0], [1], [0, 0, 1, 1], [], []>} : vector<16x128xf32>, vector<128x128xf32>, vector<16x128xf32> -> vector<16x128xf32>
    %cst_43 = arith.constant dense<0.000000e+00> : vector<8x128xf32>
    %120 = tpu.matmul %118, %119, %cst_43 {dimension_numbers = #tpu.dot_dimension_numbers<[1], [0], [0], [1], [0, 0, 1, 1], [], []>} : vector<8x16xf32>, vector<16x128xf32>, vector<8x128xf32> -> vector<8x128xf32>
    %cst_44 = arith.constant dense<0.000000e+00> : vector<16x128xf32>
    %121 = tpu.matmul %10, %111, %cst_44 {dimension_numbers = #tpu.dot_dimension_numbers<[1], [0], [0], [1], [0, 0, 1, 1], [], []>} : vector<16x128xf32>, vector<128x128xf32>, vector<16x128xf32> -> vector<16x128xf32>
    %cst_45 = arith.constant dense<0.000000e+00> : vector<8x128xf32>
    %122 = tpu.matmul %118, %121, %cst_45 {dimension_numbers = #tpu.dot_dimension_numbers<[1], [0], [0], [1], [0, 0, 1, 1], [], []>} : vector<8x16xf32>, vector<16x128xf32>, vector<8x128xf32> -> vector<8x128xf32>
    %123 = tpu.iota {dimensions = array<i32: 0>} : vector<8x128xi32>
    %124 = tpu.iota {dimensions = array<i32: 1>} : vector<8x128xi32>
    %c127_i32_46 = arith.constant 127 : i32
    %125 = tpu.dynamic_rotate %120 by %c127_i32_46 dim 1 : vector<8x128xf32>, i32 -> vector<8x128xf32>
    %c127_i32_47 = arith.constant 127 : i32
    %126 = tpu.dynamic_rotate %122 by %c127_i32_47 dim 1 : vector<8x128xf32>, i32 -> vector<8x128xf32>
    %127 = arith.subf %125, %120 : vector<8x128xf32>
    %128 = math.absf %127 : vector<8x128xf32>
    %c7_i32 = arith.constant 7 : i32
    %129 = vector.broadcast %c7_i32 : i32 to vector<8x128xi32>
    %130 = arith.cmpi slt, %124, %129 : vector<8x128xi32>
    %131 = arith.mulf %122, %126 : vector<8x128xf32>
    %cst_48 = arith.constant 0.000000e+00 : f32
    %132 = vector.broadcast %cst_48 : f32 to vector<8x128xf32>
    %133 = arith.select %130, %131, %132 : vector<8x128xi1>, vector<8x128xf32>
    %134 = arith.mulf %128, %133 : vector<8x128xf32>
    %c7_i32_49 = arith.constant 7 : i32
    %135 = tpu.dynamic_rotate %120 by %c7_i32_49 dim 0 : vector<8x128xf32>, i32 -> vector<8x128xf32>
    %c7_i32_50 = arith.constant 7 : i32
    %136 = tpu.dynamic_rotate %122 by %c7_i32_50 dim 0 : vector<8x128xf32>, i32 -> vector<8x128xf32>
    %137 = arith.subf %135, %120 : vector<8x128xf32>
    %138 = math.absf %137 : vector<8x128xf32>
    %c7_i32_51 = arith.constant 7 : i32
    %139 = vector.broadcast %c7_i32_51 : i32 to vector<8x128xi32>
    %140 = arith.cmpi slt, %123, %139 : vector<8x128xi32>
    %141 = arith.mulf %122, %136 : vector<8x128xf32>
    %cst_52 = arith.constant 0.000000e+00 : f32
    %142 = vector.broadcast %cst_52 : f32 to vector<8x128xf32>
    %143 = arith.select %140, %141, %142 : vector<8x128xi1>, vector<8x128xf32>
    %144 = arith.mulf %138, %143 : vector<8x128xf32>
    %cst_53 = arith.constant 1.000000e+00 : f32
    %145 = vector.broadcast %cst_53 : f32 to vector<1x8xf32>
    %146 = arith.addf %134, %144 : vector<8x128xf32>
    %cst_54 = arith.constant dense<0.000000e+00> : vector<1x128xf32>
    %147 = tpu.matmul %145, %146, %cst_54 {dimension_numbers = #tpu.dot_dimension_numbers<[1], [0], [0], [1], [0, 0, 1, 1], [], []>} : vector<1x8xf32>, vector<8x128xf32>, vector<1x128xf32> -> vector<1x128xf32>
    %148 = vector.shape_cast %147 : vector<1x128xf32> to vector<128xf32>
    %c0_55 = arith.constant 0 : index
    %c3 = arith.constant 3 : index
    %c0_56 = arith.constant 0 : index
    %149 = vector.load %arg3[%c0_55, %c3, %c0_56] : memref<1x16x128xf32, #tpu.memory_space<vmem>>, vector<1x1x128xf32>
    %150 = vector.shape_cast %149 : vector<1x1x128xf32> to vector<128xf32>
    %151 = vector.shape_cast %148 : vector<128xf32> to vector<1x1x128xf32>
    tpu.vector_store %arg3[%c0_55, %c3, %c0_56], %151 {strides = array<i32>} : memref<1x16x128xf32, #tpu.memory_space<vmem>>, vector<1x1x128xf32>,
    %cst_57 = arith.constant dense<0.000000e+00> : vector<1x128xf32>
    %152 = tpu.matmul %145, %122, %cst_57 {dimension_numbers = #tpu.dot_dimension_numbers<[1], [0], [0], [1], [0, 0, 1, 1], [], []>} : vector<1x8xf32>, vector<8x128xf32>, vector<1x128xf32> -> vector<1x128xf32>
    %153 = vector.shape_cast %152 : vector<1x128xf32> to vector<128xf32>
    %c0_58 = arith.constant 0 : index
    %c6 = arith.constant 6 : index
    %c0_59 = arith.constant 0 : index
    %154 = vector.load %arg3[%c0_58, %c6, %c0_59] : memref<1x16x128xf32, #tpu.memory_space<vmem>>, vector<1x1x128xf32>
    %155 = vector.shape_cast %154 : vector<1x1x128xf32> to vector<128xf32>
    %156 = vector.shape_cast %153 : vector<128xf32> to vector<1x1x128xf32>
    tpu.vector_store %arg3[%c0_58, %c6, %c0_59], %156 {strides = array<i32>} : memref<1x16x128xf32, #tpu.memory_space<vmem>>, vector<1x1x128xf32>,
    %157 = tpu.iota {dimensions = array<i32: 0>} : vector<128x128xi32>
    %158 = tpu.iota {dimensions = array<i32: 1>} : vector<128x128xi32>
    %c2_i32_60 = arith.constant 2 : i32
    %159 = vector.broadcast %c2_i32_60 : i32 to vector<128x128xi32>
    %160 = arith.muli %159, %158 : vector<128x128xi32>
    %161 = arith.cmpi eq, %157, %160 : vector<128x128xi32>
    %162 = arith.extui %161 : vector<128x128xi1> to vector<128x128xi32>
    %163 = arith.sitofp %162 : vector<128x128xi32> to vector<128x128xf32>
    %164 = tpu.iota {dimensions = array<i32: 0>} : vector<8x8xi32>
    %165 = tpu.iota {dimensions = array<i32: 1>} : vector<8x8xi32>
    %c2_i32_61 = arith.constant 2 : i32
    %166 = vector.broadcast %c2_i32_61 : i32 to vector<8x8xi32>
    %167 = arith.muli %166, %164 : vector<8x8xi32>
    %168 = arith.cmpi eq, %165, %167 : vector<8x8xi32>
    %169 = arith.extui %168 : vector<8x8xi1> to vector<8x8xi32>
    %170 = arith.sitofp %169 : vector<8x8xi32> to vector<8x8xf32>
    %cst_62 = arith.constant dense<0.000000e+00> : vector<8x128xf32>
    %171 = tpu.matmul %120, %163, %cst_62 {dimension_numbers = #tpu.dot_dimension_numbers<[1], [0], [0], [1], [0, 0, 1, 1], [], []>} : vector<8x128xf32>, vector<128x128xf32>, vector<8x128xf32> -> vector<8x128xf32>
    %cst_63 = arith.constant dense<0.000000e+00> : vector<8x128xf32>
    %172 = tpu.matmul %170, %171, %cst_63 {dimension_numbers = #tpu.dot_dimension_numbers<[1], [0], [0], [1], [0, 0, 1, 1], [], []>} : vector<8x8xf32>, vector<8x128xf32>, vector<8x128xf32> -> vector<8x128xf32>
    %cst_64 = arith.constant dense<0.000000e+00> : vector<8x128xf32>
    %173 = tpu.matmul %122, %163, %cst_64 {dimension_numbers = #tpu.dot_dimension_numbers<[1], [0], [0], [1], [0, 0, 1, 1], [], []>} : vector<8x128xf32>, vector<128x128xf32>, vector<8x128xf32> -> vector<8x128xf32>
    %cst_65 = arith.constant dense<0.000000e+00> : vector<8x128xf32>
    %174 = tpu.matmul %170, %173, %cst_65 {dimension_numbers = #tpu.dot_dimension_numbers<[1], [0], [0], [1], [0, 0, 1, 1], [], []>} : vector<8x8xf32>, vector<8x128xf32>, vector<8x128xf32> -> vector<8x128xf32>
    %175 = tpu.iota {dimensions = array<i32: 0>} : vector<8x128xi32>
    %176 = tpu.iota {dimensions = array<i32: 1>} : vector<8x128xi32>
    %c127_i32_66 = arith.constant 127 : i32
    %177 = tpu.dynamic_rotate %172 by %c127_i32_66 dim 1 : vector<8x128xf32>, i32 -> vector<8x128xf32>
    %c127_i32_67 = arith.constant 127 : i32
    %178 = tpu.dynamic_rotate %174 by %c127_i32_67 dim 1 : vector<8x128xf32>, i32 -> vector<8x128xf32>
    %179 = arith.subf %177, %172 : vector<8x128xf32>
    %180 = math.absf %179 : vector<8x128xf32>
    %c3_i32 = arith.constant 3 : i32
    %181 = vector.broadcast %c3_i32 : i32 to vector<8x128xi32>
    %182 = arith.cmpi slt, %176, %181 : vector<8x128xi32>
    %183 = arith.mulf %174, %178 : vector<8x128xf32>
    %cst_68 = arith.constant 0.000000e+00 : f32
    %184 = vector.broadcast %cst_68 : f32 to vector<8x128xf32>
    %185 = arith.select %182, %183, %184 : vector<8x128xi1>, vector<8x128xf32>
    %186 = arith.mulf %180, %185 : vector<8x128xf32>
    %c7_i32_69 = arith.constant 7 : i32
    %187 = tpu.dynamic_rotate %172 by %c7_i32_69 dim 0 : vector<8x128xf32>, i32 -> vector<8x128xf32>
    %c7_i32_70 = arith.constant 7 : i32
    %188 = tpu.dynamic_rotate %174 by %c7_i32_70 dim 0 : vector<8x128xf32>, i32 -> vector<8x128xf32>
    %189 = arith.subf %187, %172 : vector<8x128xf32>
    %190 = math.absf %189 : vector<8x128xf32>
    %c3_i32_71 = arith.constant 3 : i32
    %191 = vector.broadcast %c3_i32_71 : i32 to vector<8x128xi32>
    %192 = arith.cmpi slt, %175, %191 : vector<8x128xi32>
    %193 = arith.mulf %174, %188 : vector<8x128xf32>
    %cst_72 = arith.constant 0.000000e+00 : f32
    %194 = vector.broadcast %cst_72 : f32 to vector<8x128xf32>
    %195 = arith.select %192, %193, %194 : vector<8x128xi1>, vector<8x128xf32>
    %196 = arith.mulf %190, %195 : vector<8x128xf32>
    %cst_73 = arith.constant 1.000000e+00 : f32
    %197 = vector.broadcast %cst_73 : f32 to vector<1x8xf32>
    %198 = arith.addf %186, %196 : vector<8x128xf32>
    %cst_74 = arith.constant dense<0.000000e+00> : vector<1x128xf32>
    %199 = tpu.matmul %197, %198, %cst_74 {dimension_numbers = #tpu.dot_dimension_numbers<[1], [0], [0], [1], [0, 0, 1, 1], [], []>} : vector<1x8xf32>, vector<8x128xf32>, vector<1x128xf32> -> vector<1x128xf32>
    %200 = vector.shape_cast %199 : vector<1x128xf32> to vector<128xf32>
    %c0_75 = arith.constant 0 : index
    %c4 = arith.constant 4 : index
    %c0_76 = arith.constant 0 : index
    %201 = vector.load %arg3[%c0_75, %c4, %c0_76] : memref<1x16x128xf32, #tpu.memory_space<vmem>>, vector<1x1x128xf32>
    %202 = vector.shape_cast %201 : vector<1x1x128xf32> to vector<128xf32>
    %203 = vector.shape_cast %200 : vector<128xf32> to vector<1x1x128xf32>
    tpu.vector_store %arg3[%c0_75, %c4, %c0_76], %203 {strides = array<i32>} : memref<1x16x128xf32, #tpu.memory_space<vmem>>, vector<1x1x128xf32>,
    %cst_77 = arith.constant dense<0.000000e+00> : vector<1x128xf32>
    %204 = tpu.matmul %197, %174, %cst_77 {dimension_numbers = #tpu.dot_dimension_numbers<[1], [0], [0], [1], [0, 0, 1, 1], [], []>} : vector<1x8xf32>, vector<8x128xf32>, vector<1x128xf32> -> vector<1x128xf32>
    %205 = vector.shape_cast %204 : vector<1x128xf32> to vector<128xf32>
    %c0_78 = arith.constant 0 : index
    %c7 = arith.constant 7 : index
    %c0_79 = arith.constant 0 : index
    %206 = vector.load %arg3[%c0_78, %c7, %c0_79] : memref<1x16x128xf32, #tpu.memory_space<vmem>>, vector<1x1x128xf32>
    %207 = vector.shape_cast %206 : vector<1x1x128xf32> to vector<128xf32>
    %208 = vector.shape_cast %205 : vector<128xf32> to vector<1x1x128xf32>
    tpu.vector_store %arg3[%c0_78, %c7, %c0_79], %208 {strides = array<i32>} : memref<1x16x128xf32, #tpu.memory_space<vmem>>, vector<1x1x128xf32>,
    %209 = tpu.iota {dimensions = array<i32: 0>} : vector<128x128xi32>
    %210 = tpu.iota {dimensions = array<i32: 1>} : vector<128x128xi32>
    %c2_i32_80 = arith.constant 2 : i32
    %211 = vector.broadcast %c2_i32_80 : i32 to vector<128x128xi32>
    %212 = arith.muli %211, %210 : vector<128x128xi32>
    %213 = arith.cmpi eq, %209, %212 : vector<128x128xi32>
    %214 = arith.extui %213 : vector<128x128xi1> to vector<128x128xi32>
    %215 = arith.sitofp %214 : vector<128x128xi32> to vector<128x128xf32>
    %216 = tpu.iota {dimensions = array<i32: 0>} : vector<8x8xi32>
    %217 = tpu.iota {dimensions = array<i32: 1>} : vector<8x8xi32>
    %c2_i32_81 = arith.constant 2 : i32
    %218 = vector.broadcast %c2_i32_81 : i32 to vector<8x8xi32>
    %219 = arith.muli %218, %216 : vector<8x8xi32>
    %220 = arith.cmpi eq, %217, %219 : vector<8x8xi32>
    %221 = arith.extui %220 : vector<8x8xi1> to vector<8x8xi32>
    %222 = arith.sitofp %221 : vector<8x8xi32> to vector<8x8xf32>
    %cst_82 = arith.constant dense<0.000000e+00> : vector<8x128xf32>
    %223 = tpu.matmul %172, %215, %cst_82 {dimension_numbers = #tpu.dot_dimension_numbers<[1], [0], [0], [1], [0, 0, 1, 1], [], []>} : vector<8x128xf32>, vector<128x128xf32>, vector<8x128xf32> -> vector<8x128xf32>
    %cst_83 = arith.constant dense<0.000000e+00> : vector<8x128xf32>
    %224 = tpu.matmul %222, %223, %cst_83 {dimension_numbers = #tpu.dot_dimension_numbers<[1], [0], [0], [1], [0, 0, 1, 1], [], []>} : vector<8x8xf32>, vector<8x128xf32>, vector<8x128xf32> -> vector<8x128xf32>
    %cst_84 = arith.constant dense<0.000000e+00> : vector<8x128xf32>
    %225 = tpu.matmul %174, %215, %cst_84 {dimension_numbers = #tpu.dot_dimension_numbers<[1], [0], [0], [1], [0, 0, 1, 1], [], []>} : vector<8x128xf32>, vector<128x128xf32>, vector<8x128xf32> -> vector<8x128xf32>
    %cst_85 = arith.constant dense<0.000000e+00> : vector<8x128xf32>
    %226 = tpu.matmul %222, %225, %cst_85 {dimension_numbers = #tpu.dot_dimension_numbers<[1], [0], [0], [1], [0, 0, 1, 1], [], []>} : vector<8x8xf32>, vector<8x128xf32>, vector<8x128xf32> -> vector<8x128xf32>
    %227 = tpu.iota {dimensions = array<i32: 0>} : vector<8x128xi32>
    %228 = tpu.iota {dimensions = array<i32: 1>} : vector<8x128xi32>
    %c127_i32_86 = arith.constant 127 : i32
    %229 = tpu.dynamic_rotate %224 by %c127_i32_86 dim 1 : vector<8x128xf32>, i32 -> vector<8x128xf32>
    %c127_i32_87 = arith.constant 127 : i32
    %230 = tpu.dynamic_rotate %226 by %c127_i32_87 dim 1 : vector<8x128xf32>, i32 -> vector<8x128xf32>
    %231 = arith.subf %229, %224 : vector<8x128xf32>
    %232 = math.absf %231 : vector<8x128xf32>
    %c1_i32 = arith.constant 1 : i32
    %233 = vector.broadcast %c1_i32 : i32 to vector<8x128xi32>
    %234 = arith.cmpi slt, %228, %233 : vector<8x128xi32>
    %235 = arith.mulf %226, %230 : vector<8x128xf32>
    %cst_88 = arith.constant 0.000000e+00 : f32
    %236 = vector.broadcast %cst_88 : f32 to vector<8x128xf32>
    %237 = arith.select %234, %235, %236 : vector<8x128xi1>, vector<8x128xf32>
    %238 = arith.mulf %232, %237 : vector<8x128xf32>
    %c7_i32_89 = arith.constant 7 : i32
    %239 = tpu.dynamic_rotate %224 by %c7_i32_89 dim 0 : vector<8x128xf32>, i32 -> vector<8x128xf32>
    %c7_i32_90 = arith.constant 7 : i32
    %240 = tpu.dynamic_rotate %226 by %c7_i32_90 dim 0 : vector<8x128xf32>, i32 -> vector<8x128xf32>
    %241 = arith.subf %239, %224 : vector<8x128xf32>
    %242 = math.absf %241 : vector<8x128xf32>
    %c1_i32_91 = arith.constant 1 : i32
    %243 = vector.broadcast %c1_i32_91 : i32 to vector<8x128xi32>
    %244 = arith.cmpi slt, %227, %243 : vector<8x128xi32>
    %245 = arith.mulf %226, %240 : vector<8x128xf32>
    %cst_92 = arith.constant 0.000000e+00 : f32
    %246 = vector.broadcast %cst_92 : f32 to vector<8x128xf32>
    %247 = arith.select %244, %245, %246 : vector<8x128xi1>, vector<8x128xf32>
    %248 = arith.mulf %242, %247 : vector<8x128xf32>
    %cst_93 = arith.constant 1.000000e+00 : f32
    %249 = vector.broadcast %cst_93 : f32 to vector<1x8xf32>
    %250 = arith.addf %238, %248 : vector<8x128xf32>
    %cst_94 = arith.constant dense<0.000000e+00> : vector<1x128xf32>
    %251 = tpu.matmul %249, %250, %cst_94 {dimension_numbers = #tpu.dot_dimension_numbers<[1], [0], [0], [1], [0, 0, 1, 1], [], []>} : vector<1x8xf32>, vector<8x128xf32>, vector<1x128xf32> -> vector<1x128xf32>
    %252 = vector.shape_cast %251 : vector<1x128xf32> to vector<128xf32>
    %c0_95 = arith.constant 0 : index
    %c5 = arith.constant 5 : index
    %c0_96 = arith.constant 0 : index
    %253 = vector.load %arg3[%c0_95, %c5, %c0_96] : memref<1x16x128xf32, #tpu.memory_space<vmem>>, vector<1x1x128xf32>
    %254 = vector.shape_cast %253 : vector<1x1x128xf32> to vector<128xf32>
    %255 = vector.shape_cast %252 : vector<128xf32> to vector<1x1x128xf32>
    tpu.vector_store %arg3[%c0_95, %c5, %c0_96], %255 {strides = array<i32>} : memref<1x16x128xf32, #tpu.memory_space<vmem>>, vector<1x1x128xf32>,
    %cst_97 = arith.constant dense<0.000000e+00> : vector<1x128xf32>
    %256 = tpu.matmul %249, %226, %cst_97 {dimension_numbers = #tpu.dot_dimension_numbers<[1], [0], [0], [1], [0, 0, 1, 1], [], []>} : vector<1x8xf32>, vector<8x128xf32>, vector<1x128xf32> -> vector<1x128xf32>
    %257 = vector.shape_cast %256 : vector<1x128xf32> to vector<128xf32>
    %c0_98 = arith.constant 0 : index
    %c8 = arith.constant 8 : index
    %c0_99 = arith.constant 0 : index
    %258 = vector.load %arg3[%c0_98, %c8, %c0_99] : memref<1x16x128xf32, #tpu.memory_space<vmem>>, vector<1x1x128xf32>
    %259 = vector.shape_cast %258 : vector<1x1x128xf32> to vector<128xf32>
    %260 = vector.shape_cast %257 : vector<128xf32> to vector<1x1x128xf32>
    tpu.vector_store %arg3[%c0_98, %c8, %c0_99], %260 {strides = array<i32>} : memref<1x16x128xf32, #tpu.memory_space<vmem>>, vector<1x1x128xf32>,
    return
  }
  func.func @transform_0(%arg0: i32) -> (i32, i32, i32) {
    %c0_i32 = arith.constant 0 : i32
    %c0_i32_0 = arith.constant 0 : i32
    %c0_i32_1 = arith.constant 0 : i32
    return %arg0, %c0_i32, %c0_i32_0 : i32, i32, i32
  }
  func.func @transform_1(%arg0: i32) -> (i32, i32, i32) {
    %c0_i32 = arith.constant 0 : i32
    %c0_i32_0 = arith.constant 0 : i32
    %c0_i32_1 = arith.constant 0 : i32
    return %arg0, %c0_i32, %c0_i32_0 : i32, i32, i32
  }
  func.func @transform_2(%arg0: i32) -> (i32, i32, i32) {
    %c0_i32 = arith.constant 0 : i32
    %c0_i32_0 = arith.constant 0 : i32
    %c0_i32_1 = arith.constant 0 : i32
    return %arg0, %c0_i32, %c0_i32_0 : i32, i32, i32
  }
}

</mosaic_0001>

<bundles_post_ra>
// kernel: tpu_custom_call.1
= control target key start
LH: loop header
LB: loop body
LE: loop exit
PB: predicated region body
PF: predicated region fallthrough
CT: control target
= control target key end

     0   :  { %s4172_s0 = inlined_call_operand.hbm [shape: f32[2,16,128], index: 0, kind: input, shape index: {}]   ;;  %s4173_s1 = inlined_call_operand.hbm [shape: f32[2,16,128], index: 1, kind: input, shape index: {}]   ;;  %s4174_s2 = inlined_call_operand.hbm [shape: f32[2,16,128], index: 2, kind: output, shape index: {}]  }
   0x1   :  { %4177 = sst [smem:[#allocation11_spill]] %s4172_s0 }
   0x2   :  { %4178 = sst [smem:[#allocation12_spill]] %s4173_s1 }
   0x3   :  { %7 = vsyncpa [#allocation3], 0 }
   0x4   :  { %9 = vsyncpa [#allocation3 + $0x1], 0 }
   0x5   :  { %10 = vsyncpa [#allocation6], 0 }
   0x6   :  { %12 = vsyncpa [#allocation6 + $0x1], 0 }
   0x7   :  { %13 = vsyncpa [#allocation4], 0 }
   0x8   :  { %15 = vsyncpa [#allocation4 + $0x1], 0  ;;  %s3398_s9 = smov 0   ;;  %s3400_s10 = smov 0  }
   0x9   :  { %s3402_s11 = smov 0   ;;  %s3404_s12 = smov 0  }
   0xa LB: > { %s3419_s13 = sadd.s32 4294967295, %s3368_s12   ;;  %s2338_s14 = sadd.s32 4294967294, %s3368_s12   ;;  %s3368_s12 = sphi %s3404_s12, %s4210_s12   ;;  %s3364_s11 = sphi %s3402_s11, %s4209_s11   ;;  %s3360_s10 = sphi %s3400_s10, %s4208_s10   ;;  %s3356_s9 = sphi %s3398_s9, %s4207_s9  }
   0xb   : > { %s3423_s15 = sadd.s32 1, %s3368_s12   ;;  %s28_s16 = sadd.s32 1, %s3364_s11 }
   0xc   : > { %s25_s17 = ssub.s32 %s3368_s12, %s3423_s15  ;;  %p35_p0 = scmp.ne.s32.totalorder %s3364_s11, %s3360_s10 }
   0xd   : > { %p26_p1 = scmp.eq.s32.totalorder %s25_s17, 0  ;;  %p36_p2 = scmp.eq.s32.totalorder %s3368_s12, 0 }
   0xe   : > { %p41_p3 = scmp.ne.s32.totalorder %s3360_s10, %s3356_s9  ;;  %p42_p4 = scmp.eq.s32.totalorder %s3419_s13, 0 }
   0xf   : > { %s3435_s18 = scalar_select %p26_p1, %s3364_s11, %s28_s16  }
  0x10   : > { %p3437_p5 = por %p36_p2, %p35_p0  ;;  %p3441_p6 = por %p42_p4, %p41_p3 }
  0x11   : > { %p91_p7 = scmp.eq.s32.totalorder %s3419_s13, 1  ;;  %p97_p8 = scmp.eq.s32.totalorder %s2338_s14, 1 }
  0x12   : > { %s4180_s20 = scalar_select %p3441_p6, 1, 0 }
  0x13   : > { %p3187_p10 = scmp.lt.s32.totalorder %s3368_s12, 2  ;;  %p3448_p11 = por %p91_p7, %p35_p0 }
  0x14   : > { %p3452_p12 = por %p97_p8, %p41_p3  ;;  %s3457_s23 = sand.u32 1, %s3364_s11  }
  0x15   : > { %s4181_s21 = scalar_select %p3448_p11, 1, 0 }
  0x16   : > { %s4182_s22 = scalar_select %p3452_p12, 1, 0 }
  0x17   : > { %s2494_s24 = sshll.u32 %s3368_s12, 8  ;;  %s2341_s25 = sshll.u32 %s3457_s23, 4 }
  0x18   : > { %s4183_s0 = sld [smem:[#allocation11_spill]]  ;;  %s121_s29 = scalar_lea.vmem [#allocation2], %s2341_s25 }
  0x19   : > { %s128_s30 = sshll.u32 %s121_s29, 4  ;;  %p3472_p13 = pnand %p3187_p10, %p3437_p5  ;;  %s3476_s30 = int_to_ptr.vmem [resolvable:$true] %s128_s30 }
  0x1a   : > { %s118_s4 = scalar_lea.sflag [#allocation3], %s3457_s23 }
  0x1b   : > { %p3240_p1 = pneg %p3472_p13 }
  0x1e   : > { %s3466_s28 = scalar_lea.hbm %s4183_s0, %s2494_s24  ;;  %s3243_s8 = scalar_lea.hbm %s4183_s0, 512 }
  0x1f   : > { %s3238_s5 = scalar_lea.hbm %s3466_s28, 256  ;;  %p3244_p4 = scmp.lt.u32.totalorder %s3466_s28, %s4183_s0 }
  0x20   : > { %p3239_p0 = scmp.ne.s32.totalorder %s3466_s28, %s3238_s5  ;;  %p3245_p5 = scmp.lt.u32.totalorder %s3243_s8, %s3238_s5 }
  0x21   : > { %p3247_p8 = scmp.lt.u32.totalorder %s3238_s5, %s3466_s28 }
  0x22   : > { %p3241_p2 = pnand %p3240_p1, %p3239_p0  ;;  %p3246_p7 = por %p3245_p5, %p3244_p4 }
  0x24   : > { %p3242_p3 = pneg %p3241_p2  ;;  %p3248_p10 = por %p3247_p8, %p3246_p7 }
  0x26   : > { %p3249_p9 = pnand %p3248_p10, %p3242_p3 }
  0x28   : > { %3252 = shalt.err (!%p3249_p9)
}
  0x29   : > { %s3253_s17 = scalar_lea.vmem %s3476_s30, 256  ;;  %s3370_s19 = smov [#allocation2]  }
  0x2a   : > { %p3254_p0 = scmp.ne.s32.totalorder %s3476_s30, %s3253_s17  ;;  %s3258_s26 = sshll.u32 %s3370_s19, 4  ;;  %s3259_s26 = int_to_ptr.vmem [resolvable:$false] %s3258_s26 }
  0x2b   : > { %s3260_s27 = scalar_lea.vmem %s3259_s26, 512  ;;  %p3261_p11 = scmp.lt.s32.totalorder %s3476_s30, %s3259_s26 }
  0x2c   : > { %p3256_p2 = pnand %p3254_p0, %p3240_p1  ;;  %p3262_p4 = scmp.lt.s32.totalorder %s3260_s27, %s3253_s17 }
  0x2e   : > { %p3257_p12 = pneg %p3256_p2  ;;  %p3263_p5 = por %p3262_p4, %p3261_p11 }
  0x30   : > { %p3264_p7 = pnand %p3263_p5, %p3257_p12 }
  0x32   : > { %3267 = shalt.err (!%p3264_p7)
}
  0x33   : > { %s3371_s29 = smov 128   ;;  %s3372_s5 = smov 8  }
  0x34   : > { %3179 = dma.hbm_to_vmem [thread:$0]  (!%p3472_p13), %s3466_s28, 256, %s3476_s30, %s118_s4, %s3371_s29, %s3371_s29, %s3372_s5  }
  0x35   : > { %p2347_p9 = scmp.ge.s32.totalorder %s3368_s12, 1  ;;  %p157_p11 = scmp.lt.s32.totalorder %s3368_s12, 3 }
  0x36   : > { %s4186_s1 = sld [smem:[#allocation12_spill]]  ;;  %s142_s16 = scalar_lea.vmem [#allocation5], %s2341_s25 }
  0x37   : > { %p3511_p12 = pnand %p2347_p9, %p157_p11  ;;  %s149_s17 = sshll.u32 %s142_s16, 4  ;;  %s3524_s17 = int_to_ptr.vmem [resolvable:$true] %s149_s17 }
  0x38   : > { %s139_s28 = scalar_lea.sflag [#allocation6], %s3457_s23 }
  0x3c   : > { %s3520_s14 = scalar_lea.hbm %s4186_s1, %s2494_s24  ;;  %s3273_s24 = scalar_lea.hbm %s4186_s1, 512 }
  0x3d   : > { %s3268_s30 = scalar_lea.hbm %s3520_s14, 256  ;;  %p3274_p0 = scmp.lt.u32.totalorder %s3520_s14, %s4186_s1 }
  0x3e   : > { %p3269_p3 = scmp.ne.s32.totalorder %s3520_s14, %s3268_s30  ;;  %p3275_p2 = scmp.lt.u32.totalorder %s3273_s24, %s3268_s30 }
  0x3f   : > { %p3277_p5 = scmp.lt.u32.totalorder %s3268_s30, %s3520_s14 }
  0x40   : > { %p3271_p8 = pnand %p3269_p3, %p3240_p1  ;;  %p3276_p4 = por %p3275_p2, %p3274_p0 }
  0x42   : > { %p3272_p10 = pneg %p3271_p8  ;;  %p3278_p7 = por %p3277_p5, %p3276_p4 }
  0x44   : > { %p3279_p9 = pnand %p3278_p7, %p3272_p10 }
  0x46   : > { %3282 = shalt.err (!%p3279_p9)
}
  0x47   : > { %s3283_s25 = scalar_lea.vmem %s3524_s17, 256  ;;  %s3373_s7 = smov [#allocation5]  }
  0x48   : > { %p3284_p11 = scmp.ne.s32.totalorder %s3524_s17, %s3283_s25  ;;  %s3288_s8 = sshll.u32 %s3373_s7, 4  ;;  %s3289_s8 = int_to_ptr.vmem [resolvable:$false] %s3288_s8 }
  0x49   : > { %s3290_s16 = scalar_lea.vmem %s3289_s8, 512  ;;  %p3291_p6 = scmp.lt.s32.totalorder %s3524_s17, %s3289_s8 }
  0x4a   : > { %p3286_p3 = pnand %p3284_p11, %p3240_p1  ;;  %p3292_p0 = scmp.lt.s32.totalorder %s3290_s16, %s3283_s25 }
  0x4c   : > { %p3287_p8 = pneg %p3286_p3  ;;  %p3293_p2 = por %p3292_p0, %p3291_p6 }
  0x4e   : > { %p3294_p4 = pnand %p3293_p2, %p3287_p8 }
  0x50   : > { %3297 = shalt.err (!%p3294_p4)
}
  0x51   : > { %3182 = dma.hbm_to_vmem [thread:$0]  (!%p3472_p13), %s3520_s14, 256, %s3524_s17, %s139_s28, %s3371_s29, %s3371_s29, %s3372_s5  }
  0x52   : > { %161 = sbr.rel (%p3511_p12) target bundleno = 3317 (0xcf5), region = 28  ;;  %s3558_s30 = sand.u32 (!%p3511_p12), 1, %s3360_s10  }
  0x53   : > { %s3561_s4 = sshll.u32 (!%p3511_p12), %s3558_s30, 4  ;;  %s164_s3 = scalar_lea.sflag (!%p3511_p12), [#allocation3], %s3558_s30 }
  0x54   : > { %s167_s19 = scalar_lea.vmem (!%p3511_p12), [#allocation2], %s3561_s4  ;;  %p4187_p6 = scmp.ne.s32.totalorder (!%p3511_p12), %s4180_s20, 0 }
  0x59   : > { %3343 = dma.done.wait (%p4187_p6), %s164_s3, 256  }
  0x5a   : > { %3345 = vsyncadd (%p4187_p6), %s164_s3, 4294967040  ;;  %s173_s23 = scalar_lea.sflag [#allocation6], %s3558_s30  ;;  %s176_s29 = scalar_lea.vmem [#allocation5], %s3561_s4 }
  0x5b   : > { %3347 = dma.done.wait (%p4187_p6), %s173_s23, 256  }
  0x5c   : > { %3349 = vsyncadd (%p4187_p6), %s173_s23, 4294967040  ;;  %v3374_v0 = vmov 0.0|0.0   ;;  %vm3375_vm0 = vmmov 0   ;;  %v3376_v1 = vmov 0.0   ;;  %v3581_v2 = vld [vmem:[%s167_s19] sm:$0xff]  ;;  %v3585_v4 = vld [vmem:[%s167_s19 + $0x8] sm:$0xff]  ;;  %v703_v44 = vlaneseq }
  0x5d   : > { %2971 = vmatprep.subr.bf16.mxu0 %v3374_v0  ;;  %2652 = vmatprep.mubr.msk.f32.mxu0 %vm3375_vm0, %v3376_v1  ;;  %v3583_v3 = vld [vmem:[%s176_s29] sm:$0xff]  ;;  %v3587_v5 = vld [vmem:[%s176_s29 + $0x8] sm:$0xff]  ;;  %vm218_vm3 = vcmask 130048   ;;  %v3377_v19 = vmov 1.0   ;;  %v3378_v20 = vmov 1.0|1.0  }
  0x5e   : > { %2974 = vmatprep.subr.bf16.mxu1 %v3374_v0  ;;  %2659 = vmatprep.mubr.msk.f32.mxu1 %vm3375_vm0, %v3376_v1  ;;  %vm208_vm1 = vcmp.gt.f32.partialorder %v3583_v3, 0.0  ;;  %vm209_vm2 = vcmp.gt.f32.partialorder %v3587_v5, 0.0  ;;  %s3644_s20 = scalar_lea.vmem [#allocation7], %s3561_s4  ;;  %vm576_vm5 = vcmask 1040384   ;;  %v3659_v46 = vand.u32 127, %v703_v44  ;;  %p4204_p12 = scmp.ne.s32.totalorder %s4181_s21, 0 }
  0x5f   : > { %v3594_v6 = vsel %vm208_vm1, 1.0, %v3376_v1  ;;  %v3599_v7 = vsel %vm209_vm2, 1.0, %v3376_v1  ;;  %vm2978_vm4 = vmpackc.low %vm209_vm2, %vm208_vm1  ;;  %206 = vst [vmem:[%s3644_s20] sm:$0xff] %v3376_v1  ;;  %v3663_v50 = vshrl.u32 %v703_v44, 7 }
  0x60   : > { %v214_v8 = vmul.f32 %v3594_v6, %v3581_v2  ;;  %v215_v9 = vmul.f32 %v3599_v7, %v3585_v4  ;;  %v504_v17 = vmul.f32 %v3594_v6, %v3583_v3  ;;  %v505_v18 = vmul.f32 %v3599_v7, %v3587_v5  ;;  %207 = vst [vmem:[%s3644_s20 + $0x8] sm:$0xff] %v3376_v1 }
  0x61   : > { %v3666_v53 = vadd.s32 8, %v3663_v50  ;;  %v3669_v54 = vmul.u32 2, %v3659_v46  ;;  %v821_v59 = vadd.s32 16, %v3663_v50  ;;  %v822_v60 = vadd.s32 24, %v3663_v50 }
  0x62   : > { %v216_v10 = vmul.f32 %v214_v8, %v3581_v2  ;;  %v432_v11 = vmul.f32 %v214_v8, %v3583_v3  ;;  %v217_v12 = vmul.f32 %v215_v9, %v3585_v4  ;;  %v2975_v13 = vpack.c.bf16 %v215_v9, %v214_v8 }
  0x63   : > { %v433_v14 = vmul.f32 %v215_v9, %v3587_v5  ;;  %v2984_v21 = vpack.c.bf16 %v505_v18, %v504_v17  ;;  %vm836_vm6 = vcmp.eq.s32.totalorder %v3663_v50, %v3669_v54  ;;  %vm837_vm7 = vcmp.eq.s32.totalorder %v3666_v53, %v3669_v54 }
  0x64   : > { %v2972_v15 = vpack.c.bf16 %v217_v12, %v216_v10  ;;  %2976 = vmatpush3.bf16.msra.mxu1 %v2975_v13  ;;  %v3231_v63 = vpack.i.bf16 %v3599_v7, %v3594_v6  ;;  %vm3693_vm8 = vmpackc.low %vm837_vm7, %vm836_vm6  ;;  %vm838_vm9 = vcmp.eq.s32.totalorder %v821_v59, %v3669_v54  ;;  %vm839_vm10 = vcmp.eq.s32.totalorder %v822_v60, %v3669_v54 }
  0x65   : > { %v2981_v16 = vpack.c.bf16 %v433_v14, %v432_v11  ;;  %2980 = vmatprep.subr.bf16.mxu1 %v3374_v0  ;;  %v823_v8 = vadd.s32 32, %v3663_v50  ;;  %v824_v9 = vadd.s32 40, %v3663_v50  ;;  %vm3705_vm11 = vmpackc.low %vm839_vm10, %vm838_vm9  ;;  %v825_v11 = vadd.s32 48, %v3663_v50 }
  0x66   : > { %2973 = vmatpush3.bf16.msra.mxu0 %v2972_v15  ;;  %v826_v12 = vadd.s32 56, %v3663_v50  ;;  %v827_v14 = vadd.s32 64, %v3663_v50  ;;  %v828_v15 = vadd.s32 72, %v3663_v50  ;;  %v829_v17 = vadd.s32 80, %v3663_v50 }
  0x67   : > { %2977 = vmatprep.subr.bf16.mxu0 %v3374_v0  ;;  %2660 = vmatmul.mubr.msk.f32.vlgmr.msra.gmra.mrb[0].mxu1 %vm218_vm3, %v3377_v19  ;;  %vm840_vm12 = vcmp.eq.s32.totalorder %v823_v8, %v3669_v54  ;;  %vm841_vm13 = vcmp.eq.s32.totalorder %v824_v9, %v3669_v54  ;;  %vm842_vm15 = vcmp.eq.s32.totalorder %v825_v11, %v3669_v54  ;;  %v830_v18 = vadd.s32 88, %v3663_v50 }
  0x68   : > { %2982 = vmatpush3.bf16.msra.mxu1 %v2981_v16  ;;  %2673 = vmatprep.mubr.msk.f32.mxu1 %vm3375_vm0, %v3376_v1  ;;  %vm3722_vm14 = vmpackc.low %vm841_vm13, %vm840_vm12  ;;  %vm844_vm6 = vcmp.eq.s32.totalorder %v827_v14, %v3669_v54  ;;  %vm845_vm7 = vcmp.eq.s32.totalorder %v828_v15, %v3669_v54  ;;  %vm846_vm10 = vcmp.eq.s32.totalorder %v829_v17, %v3669_v54  ;;  %v884_v9 = vmul.u32 2, %v3663_v50 }
  0x69   : > { %2653 = vmatmul.mubr.msk.f32.vlgmr.msra.gmra.mrb[0].mxu0 %vm218_vm3, %v3377_v19  ;;  %2986 = vmatprep.subr.bf16.mxu1 %v3374_v0  ;;  %vm3750_vm9 = vmpackc.low %vm845_vm7, %vm844_vm6  ;;  %vm847_vm12 = vcmp.eq.s32.totalorder %v830_v18, %v3669_v54 }
  0x6a   : > { %2979 = vmatpush3.bf16.msk.msra.mxu0 %vm2978_vm4, %v3378_v20  ;;  %2666 = vmatprep.mubr.msk.f32.mxu0 %vm3375_vm0, %v3376_v1  ;;  %vm843_vm4 = vcmp.eq.s32.totalorder %v826_v12, %v3669_v54  ;;  %vm3764_vm13 = vmpackc.low %vm847_vm12, %vm846_vm10 }
  0x6b   : > { %2983 = vmatprep.subr.bf16.mxu0 %v3374_v0  ;;  %2674 = vmatmul.mubr.msk.f32.vlgmr.msra.gmra.mrb[2].mxu1 %vm218_vm3, %v3377_v19 }
  0x6c   : > { %2687 = vmatprep.mubr.msk.f32.mxu1 %vm3375_vm0, %v3376_v1 }
  0x6d   : > { %2667 = vmatmul.mubr.msk.f32.vlgmr.msra.gmra.mrb[2].mxu0 %vm218_vm3, %v3377_v19 }
  0x6e   : > { %2985 = vmatpush3.bf16.msra.mxu0 %v2984_v21  ;;  %2680 = vmatprep.mubr.msk.f32.mxu0 %vm3375_vm0, %v3376_v1 }
  0x6f   : > { %2989 = vmatprep.subr.bf16.mxu0 %v3374_v0 }
  0x71   : > { %2681 = vmatmul.mubr.msk.f32.vlgmr.msra.gmra.mrb[4].mxu0 %vm218_vm3, %v3377_v19 }
  0x72   : > { %2694 = vmatprep.mubr.msk.f32.mxu0 %vm3375_vm0, %v3376_v1 }
 0x13a   : > { %v358_v22 = vpop.f32.mrb[0].mxu1 }
 0x13b   : > { %v2661_v23 = vpop.f32.mrb[1].mxu1  ;;  %v581_v28 = vsel %vm576_vm5, %v358_v22, 0.0  ;;  %v831_v22 = vadd.s32 96, %v3663_v50 }
 0x13c   : > { %v288_v24 = vpop.f32.mrb[0].mxu0  ;;  %v832_v23 = vadd.s32 104, %v3663_v50 }
 0x13d   : > { %v2654_v25 = vpop.f32.mrb[1].mxu0  ;;  %v577_v26 = vsel %vm576_vm5, %v288_v24, 0.0 }
 0x13e   : > { %578 = vadd.xlane.f32.xlu0 %v577_v26  ;;  %v500_v27 = vpop.f32.mrb[2].mxu1  ;;  %v833_v25 = vadd.s32 112, %v3663_v50  ;;  %v834_v26 = vadd.s32 120, %v3663_v50 }
 0x13f   : > { %v2675_v29 = vpop.f32.mrb[3].mxu1  ;;  %v589_v33 = vsel %vm576_vm5, %v500_v27, 0.0 }
 0x140   : > { %v428_v30 = vpop.f32.mrb[2].mxu0  ;;  %vm850_vm7 = vcmp.eq.s32.totalorder %v833_v25, %v3669_v54  ;;  %vm851_vm10 = vcmp.eq.s32.totalorder %v834_v26, %v3669_v54 }
 0x141   : > { %702 = vst [vmem:[%s3644_s20 + $0x1] sm:$0x1] %v428_v30  ;;  %v2668_v31 = vpop.f32.mrb[3].mxu0  ;;  %v585_v32 = vsel %vm576_vm5, %v428_v30, 0.0  ;;  %vm3790_vm12 = vmpackc.low %vm851_vm10, %vm850_vm7  ;;  %vm720_vm7 = vcmp.lt.s32.totalorder %v3659_v46, 15  ;;  %vm885_vm10 = vcmp.eq.s32.totalorder %v3659_v46, %v884_v9 }
 0x142   : > { %582 = vadd.xlane.f32.xlu0 %v581_v28  ;;  %586 = vadd.xlane.f32.xlu1 %v585_v32  ;;  %v732_v31 = vrot.slane %v3594_v6, 1  ;;  %v733_v32 = vrot.slane %v3599_v7, 1  ;;  %v3839_v15 = vsel %vm885_vm10, 1.0, %v3376_v1 }
 0x144   : > { %v572_v34 = vpop.f32.mrb[4].mxu0 }
 0x145   : > { %v593_v35 = vsel %vm576_vm5, %v572_v34, 0.0  ;;  %v2682_v36 = vpop.f32.mrb[5].mxu0  ;;  %vm3736_vm5 = vmpackc.low %vm843_vm4, %vm842_vm15  ;;  %vm848_vm15 = vcmp.eq.s32.totalorder %v831_v22, %v3669_v54  ;;  %vm849_vm4 = vcmp.eq.s32.totalorder %v832_v23, %v3669_v54 }
 0x146   : > { %590 = vadd.xlane.f32.xlu1 %v589_v33  ;;  %594 = vadd.xlane.f32.xlu0 %v593_v35  ;;  %vm3778_vm6 = vmpackc.low %vm849_vm4, %vm848_vm15  ;;  %vm729_vm15 = vcmp.lt.s32.totalorder %v3663_v50, 7  ;;  %vm741_vm4 = vcmp.lt.s32.totalorder %v3666_v53, 15 }
 0x147   : > { %v735_v36 = vsel %vm729_vm15, %v733_v32, %v732_v31 }
 0x1cb   : > { %v579_v37 = vpop.xlane.xlu0 %578 }
 0x1cc   : > { %3158 = vpush %v579_v37 }
 0x1cf   : > { %v583_v38 = vpop.xlane.xlu0 %582  ;;  %v587_v39 = vpop.xlane.xlu1 %586 }
 0x1d0   : > { %3160 = vpush %v583_v38 }
 0x1d1   : > { %3162 = vpush %v587_v39 }
 0x1d3   : > { %v591_v40 = vpop.xlane.xlu1 %590  ;;  %v595_v41 = vpop.xlane.xlu0 %594 }
 0x1d4   : > { %3164 = vpush %v591_v40  ;;  %v734_v40 = vsel %vm729_vm15, %v732_v31, %v733_v32 }
 0x1d5   : > { %3166 = vpush %v595_v41  ;;  %v743_v41 = vmul.f32 %v3599_v7, %v735_v36 }
 0x1fd   : > { %s3159_s5 = spop %3158 }
 0x201   : > { %s3161_s6 = spop %3160 }
 0x202   : > { %s598_s14 = smul.f32 %s3161_s6, %s3161_s6  ;;  %s3163_s17 = spop %3162 }
 0x203   : > { %s597_s28 = smul.f32 %s3163_s17, %s3159_s5  ;;  %s610_s24 = ssub.f32 0.0, %s3161_s6 }
 0x205   : > { %s3165_s26 = spop %3164  ;;  %s599_s27 = ssub.f32 %s597_s28, %s598_s14 }
 0x206   : > { %s602_s25 = smul.f32 %s3165_s26, %s3163_s17  ;;  %s3167_s8 = spop %3166 }
 0x207   : > { %s611_s7 = smul.f32 %s3165_s26, %s610_s24  ;;  %p600_p13 = scmp.ne.f32.partialorder %s599_s27, 0.0 }
 0x208   : > { %s603_s16 = smul.f32 %s3167_s8, %s3161_s6  ;;  %s2229_s28 = scalar_lea.sflag [#allocation4], %s3558_s30 }
 0x209   : > { %s612_s4 = smul.f32 %s3167_s8, %s3159_s5  ;;  %s2242_s5 = sshll.u32 %s3644_s20, 4  ;;  %s4127_s5 = int_to_ptr.vmem [resolvable:$true] %s2242_s5 }
 0x20a   : > { %s601_s3 = scalar_select %p600_p13, %s599_s27, 1.0 }
 0x20b   : > { %s604_s19 = ssub.f32 %s602_s25, %s603_s16  ;;  %s3298_s24 = scalar_lea.vmem %s4127_s5, 256 }
 0x20c   : > { %v605_v42 = vstv %s601_s3  ;;  %s613_s23 = sadd.f32 %s612_s4, %s611_s7  ;;  %p3299_p1 = scmp.ne.s32.totalorder %s4127_s5, %s3298_s24 }
 0x20d   : > { %3236 = vrcp.f32 %v605_v42 }
 0x20e   : > { %p3300_p10 = pnand %p3299_p1, %p4204_p12 }
 0x210   : > { %p3301_p5 = pneg %p3300_p10 }
 0x217   : > { %v3237_v43 = vpop.eup %3236 }
 0x218   : > { %3168 = vpush %v3237_v43 }
 0x249   : > { %s3169_s29 = spop %3168 }
 0x24a   : > { %s608_s0 = smul.f32 %s3169_s29, %s604_s19 }
 0x24b   : > { %s617_s1 = smul.f32 %s3169_s29, %s613_s23 }
 0x24c   : > { %s4212_s0 = smov (!%p600_p13, %s608_s0), 0.0 }
 0x24d   : > { %s4214_s1 = smov (!%p600_p13, %s617_s1), 0.0  ;;  %v619_v45 = vstv %s4212_s0  ;;  %s3379_s0 = smov 127  }
 0x24e   : > { %v620_v47 = vmul.f32 %v619_v45, %v3581_v2  ;;  %v621_v48 = vmul.f32 %v619_v45, %v3585_v4  ;;  %v622_v49 = vstv %s4214_s1  ;;  %s2496_s1 = sshll.u32 %s3419_s13, 8  ;;  %s3380_s13 = smov [#allocation7]  }
 0x24f   : > { %s4125_s17 = scalar_lea.hbm %s4174_s2, %s2496_s1  ;;  %s3302_s26 = sshll.u32 %s3380_s13, 4  ;;  %s3303_s26 = int_to_ptr.vmem [resolvable:$false] %s3302_s26 }
 0x250   : > { %v623_v51 = vadd.f32 %v622_v49, %v620_v47  ;;  %v624_v52 = vadd.f32 %v622_v49, %v621_v48  ;;  %v742_v48 = vmul.f32 %v3594_v6, %v734_v40  ;;  %s3304_s27 = scalar_lea.vmem %s3303_s26, 512  ;;  %p3305_p7 = scmp.lt.s32.totalorder %s4127_s5, %s3303_s26 }
 0x251   : > { %p3306_p9 = scmp.lt.s32.totalorder %s3304_s27, %s3298_s24 }
 0x252   : > { %v625_v55 = vsub.f32 %v623_v51, %v3583_v3  ;;  %v626_v56 = vsub.f32 %v624_v52, %v3587_v5  ;;  %v745_v52 = vsel %vm741_vm4, %v743_v41, 0.0 }
 0x253   : > { %p3307_p11 = por %p3306_p9, %p3305_p7 }
 0x254   : > { %v3674_v57 = vmul.f32 %v3594_v6, %v625_v55  ;;  %v3677_v58 = vmul.f32 %v3599_v7, %v626_v56 }
 0x255   : > { %p3308_p3 = pnand %p3307_p11, %p3301_p5 }
 0x256   : > { %v629_v61 = vmul.f32 %v3674_v57, %v625_v55  ;;  %v630_v62 = vmul.f32 %v3677_v58, %v626_v56  ;;  %710 = vrot.lane.b32.xlu0 %v3677_v58, %s3379_s0  ;;  %708 = vrot.lane.b32.xlu1 %v3674_v57, %s3379_s0  ;;  %v728_v29 = vrot.slane %v3677_v58, 1  ;;  %v727_v30 = vrot.slane %v3674_v57, 1 }
 0x258   : > { %v2987_v2 = vpack.c.bf16 %v630_v62, %v629_v61  ;;  %v730_v33 = vsel %vm729_vm15, %v727_v30, %v728_v29  ;;  %v731_v34 = vsel %vm729_vm15, %v728_v29, %v727_v30 }
 0x259   : > { %v736_v38 = vsub.f32 %v730_v33, %v3674_v57  ;;  %v737_v39 = vsub.f32 %v731_v34, %v3677_v58 }
 0x25a   : > { %3232 = vrot.lane.b32.xlu1 %v3231_v63, %s3379_s0  ;;  %2988 = vmatpush3.bf16.msra.mxu1 %v2987_v2 }
 0x25b   : > { %2993 = vmatprep.subr.msk.bf16.mxu1 %vm3693_vm8, %v3378_v20  ;;  %v738_v49 = vand.u32 2147483647, %v736_v38  ;;  %v739_v51 = vand.u32 2147483647, %v737_v39 }
 0x25d   : > { %2688 = vmatmul.mubr.msk.f32.vlgmr.msra.gmra.mrb[4].mxu1 %vm218_vm3, %v3377_v19  ;;  %v746_v61 = vmul.f32 %v742_v48, %v738_v49  ;;  %v747_v62 = vmul.f32 %v745_v52, %v739_v51 }
 0x25e   : > { %2995 = vmatpush3.bf16.msk.msra.mxu1 %vm3693_vm8, %v3378_v20  ;;  %2729 = vmatprep.mubr.f32.mxu1 %v3674_v57 }
 0x25f   : > { %2997 = vmatprep.subr.msk.bf16.mxu1 %vm3705_vm11, %v3378_v20 }
 0x262   : > { %2999 = vmatpush3.bf16.msk.msra.mxu1 %vm3705_vm11, %v3378_v20 }
 0x263   : > { %3001 = vmatprep.subr.msk.bf16.mxu1 %vm3722_vm14, %v3378_v20 }
 0x266   : > { %3003 = vmatpush3.bf16.msk.msra.mxu1 %vm3722_vm14, %v3378_v20 }
 0x267   : > { %3005 = vmatprep.subr.msk.bf16.mxu1 %vm3736_vm5, %v3378_v20 }
 0x26a   : > { %3007 = vmatpush3.bf16.msk.msra.mxu1 %vm3736_vm5, %v3378_v20 }
 0x26b   : > { %3009 = vmatprep.subr.msk.bf16.mxu1 %vm3750_vm9, %v3378_v20 }
 0x26e   : > { %3011 = vmatpush3.bf16.msk.msra.mxu1 %vm3750_vm9, %v3378_v20 }
 0x26f   : > { %3013 = vmatprep.subr.msk.bf16.mxu1 %vm3764_vm13, %v3378_v20 }
 0x272   : > { %3015 = vmatpush3.bf16.msk.msra.mxu1 %vm3764_vm13, %v3378_v20 }
 0x273   : > { %3017 = vmatprep.subr.msk.bf16.mxu1 %vm3778_vm6, %v3378_v20 }
 0x276   : > { %3019 = vmatpush3.bf16.msk.msra.mxu1 %vm3778_vm6, %v3378_v20 }
 0x277   : > { %3021 = vmatprep.subr.msk.bf16.mxu1 %vm3790_vm12, %v3378_v20 }
 0x27a   : > { %3023 = vmatpush3.bf16.msk.msra.mxu1 %vm3790_vm12, %v3378_v20 }
 0x27b   : > { %3059 = vmatprep.subr.bf16.mxu1 %v3374_v0 }
 0x27d   : > { %2730 = vmatmul.mubr.f32.vlgmr.msra.gmra.mrb[6].mxu1 %v3677_v58 }
 0x27e   : > { %2778 = vmatprep.mubr.msk.f32.mxu1 %vm3375_vm0, %v3376_v1 }
 0x2c8   : > { %v709_v35 = vpop.permute.xlu1 %708  ;;  %v711_v37 = vpop.permute.xlu0 %710 }
 0x2c9   : > { %v717_v42 = vsub.f32 %v711_v37, %v3677_v58  ;;  %v716_v43 = vsub.f32 %v709_v35, %v3674_v57 }
 0x2cb   : > { %v719_v56 = vand.u32 2147483647, %v717_v42  ;;  %v718_v58 = vand.u32 2147483647, %v716_v43 }
 0x2cc   : > { %v3233_v44 = vpop.permute.xlu1 %3232 }
 0x2cd   : > { %v3235_v45 = vunpack.i.h.bf16 %v3233_v44  ;;  %v3234_v47 = vunpack.i.l.bf16 %v3233_v44 }
 0x2cf   : > { %v722_v54 = vmul.f32 %v3235_v45, %v3599_v7  ;;  %v721_v55 = vmul.f32 %v3234_v47, %v3594_v6 }
 0x2d1   : > { %v724_v57 = vsel %vm720_vm7, %v722_v54, 0.0  ;;  %v723_v59 = vsel %vm720_vm7, %v721_v55, 0.0 }
 0x2d2   : > { %v726_v53 = vmul.f32 %v724_v57, %v719_v56  ;;  %v725_v60 = vmul.f32 %v723_v59, %v718_v58 }
 0x2d4   : > { %v748_v63 = vadd.f32 %v746_v61, %v725_v60  ;;  %v749_v2 = vadd.f32 %v747_v62, %v726_v53 }
 0x2d6   : > { %v2990_v8 = vpack.c.bf16 %v749_v2, %v748_v63 }
 0x2d8   : > { %2991 = vmatpush3.bf16.msra.mxu0 %v2990_v8 }
 0x2d9   : > { %3024 = vmatprep.subr.bf16.mxu0 %v3374_v0 }
 0x2db   : > { %2695 = vmatmul.mubr.msk.f32.vlgmr.msra.gmra.mrb[6].mxu0 %vm218_vm3, %v3377_v19 }
 0x2dc   : > { %2736 = vmatprep.mubr.msk.f32.mxu0 %vm3375_vm0, %v3376_v1 }
 0x330   : > { %v697_v6 = vpop.f32.mrb[4].mxu1 }
 0x331   : > { %701 = vst [vmem:[%s3644_s20] sm:$0x1] %v697_v6  ;;  %v2689_v7 = vpop.f32.mrb[5].mxu1 }
 0x350   : > { %v2731_v11 = vpop.f32.mrb[6].mxu1 }
 0x351   : > { %v954_v12 = vpop.f32.mrb[7].mxu1 }
 0x352   : > { %v3025_v14 = vpack.c.bf16 %v2731_v11, %v954_v12 }
 0x354   : > { %3026 = vmatpush3.bf16.msra.mxu0 %v3025_v14 }
 0x355   : > { %3028 = vmatprep.subr.msk.bf16.mxu0 %vm3693_vm8, %v3378_v20 }
 0x357   : > { %2737 = vmatmul.mubr.msk.f32.vlgmr.msra.gmra.mrb[8].mxu0 %vm218_vm3, %v3839_v15 }
 0x358   : > { %3030 = vmatpush3.bf16.msk.msra.mxu0 %vm3693_vm8, %v3378_v20  ;;  %2771 = vmatprep.mubr.msk.f32.mxu0 %vm208_vm1, %v3377_v19  ;;  %vm1199_vm1 = vcmask 64512  }
 0x359   : > { %3032 = vmatprep.subr.msk.bf16.mxu0 %vm3705_vm11, %v3378_v20 }
 0x35c   : > { %3034 = vmatpush3.bf16.msk.msra.mxu0 %vm3705_vm11, %v3378_v20 }
 0x35d   : > { %3036 = vmatprep.subr.msk.bf16.mxu0 %vm3722_vm14, %v3378_v20 }
 0x360   : > { %3038 = vmatpush3.bf16.msk.msra.mxu0 %vm3722_vm14, %v3378_v20 }
 0x361   : > { %3040 = vmatprep.subr.msk.bf16.mxu0 %vm3736_vm5, %v3378_v20 }
 0x364   : > { %3042 = vmatpush3.bf16.msk.msra.mxu0 %vm3736_vm5, %v3378_v20 }
 0x365   : > { %3044 = vmatprep.subr.msk.bf16.mxu0 %vm3750_vm9, %v3378_v20 }
 0x368   : > { %3046 = vmatpush3.bf16.msk.msra.mxu0 %vm3750_vm9, %v3378_v20 }
 0x369   : > { %3048 = vmatprep.subr.msk.bf16.mxu0 %vm3764_vm13, %v3378_v20 }
 0x36c   : > { %3050 = vmatpush3.bf16.msk.msra.mxu0 %vm3764_vm13, %v3378_v20 }
 0x36d   : > { %3052 = vmatprep.subr.msk.bf16.mxu0 %vm3778_vm6, %v3378_v20 }
 0x370   : > { %3054 = vmatpush3.bf16.msk.msra.mxu0 %vm3778_vm6, %v3378_v20 }
 0x371   : > { %3056 = vmatprep.subr.msk.bf16.mxu0 %vm3790_vm12, %v3378_v20 }
 0x374   : > { %3058 = vmatpush3.bf16.msk.msra.mxu0 %vm3790_vm12, %v3378_v20 }
 0x375   : > { %2786 = vmatprep.subr.mxu0 %v3376_v1 }
 0x377   : > { %2772 = vmatmul.mubr.msk.f32.vlgmr.msra.gmra.mrb[10].mxu0 %vm209_vm2, %v3377_v19  ;;  %vm1187_vm2 = vcmp.lt.s32.totalorder %v3659_v46, 7 }
 0x378   : > { %2788 = vmatprep.mubr.msk.f32.mxu0 %vm3375_vm0, %v3376_v1 }
 0x3ae   : > { %v816_v3 = vpop.f32.mrb[6].mxu0 }
 0x3af   : > { %820 = vst [vmem:[%s3644_s20 + $0x2] sm:$0x1] %v816_v3  ;;  %v2696_v17 = vpop.f32.mrb[7].mxu0 }
 0x42a   : > { %v1032_v18 = vpop.f32.mrb[8].mxu0 }
 0x42b   : > { %1181 = vrot.lane.b32.xlu1 %v1032_v18, %s3379_s0  ;;  %v2738_v22 = vpop.f32.mrb[9].mxu0  ;;  %v1191_v5 = vrot.slane %v1032_v18, 1 }
 0x42d   : > { %v1193_v29 = vsub.f32 %v1191_v5, %v1032_v18 }
 0x42f   : > { %v1194_v34 = vand.u32 2147483647, %v1193_v29 }
 0x44a   : > { %v2773_v23 = vpop.f32.mrb[10].mxu0 }
 0x44b   : > { %v1102_v25 = vpop.f32.mrb[11].mxu0 }
 0x44c   : > { %v3060_v26 = vpack.c.bf16 %v2773_v23, %v1102_v25 }
 0x44e   : > { %3061 = vmatpush3.bf16.msra.mxu1 %v3060_v26 }
 0x44f   : > { %2781 = vmatprep.subr.mxu1 %v3376_v1 }
 0x451   : > { %2779 = vmatmul.mubr.msk.f32.vlgmr.msra.gmra.mrb[8].mxu1 %vm218_vm3, %v3839_v15  ;;  %vm1640_vm3 = vcmp.lt.s32.totalorder %v3663_v50, 3 }
 0x452   : > { %2783 = vmatprep.mubr.msk.f32.mxu1 %vm3375_vm0, %v3376_v1 }
 0x49d   : > { %v1182_v37 = vpop.permute.xlu1 %1181 }
 0x49e   : > { %v1185_v38 = vsub.f32 %v1182_v37, %v1032_v18 }
 0x4a0   : > { %v1186_v41 = vand.u32 2147483647, %v1185_v38 }
 0x524   : > { %v3907_v30 = vpop.f32.mrb[8].mxu1 }
 0x525   : > { %v1192_v31 = vrot.slane %v3907_v30, 1  ;;  %1183 = vrot.lane.b32.xlu1 %v3907_v30, %s3379_s0  ;;  %v2780_v32 = vpop.f32.mrb[9].mxu1  ;;  %2787 = vmatpush3.msra.mxu0 %v3907_v30 }
 0x526   : > { %2789 = vmatmul.mubr.msk.f32.vlgmr.msra.gmra.mrb[12].mxu0 %vm1199_vm1, %v3377_v19  ;;  %2826 = vmatprep.subr.mxu0 %v3376_v1 }
 0x527   : > { %v1195_v33 = vmul.f32 %v1192_v31, %v3907_v30  ;;  %2828 = vmatprep.mubr.msk.f32.mxu0 %vm3375_vm0, %v3376_v1 }
 0x529   : > { %v1196_v35 = vsel %vm729_vm15, %v1195_v33, 0.0  ;;  %vm1632_vm15 = vcmp.lt.s32.totalorder %v3659_v46, 3 }
 0x52a   : > { %v1197_v36 = vmul.f32 %v1196_v35, %v1194_v34 }
 0x597   : > { %v1184_v39 = vpop.permute.xlu1 %1183 }
 0x598   : > { %v1188_v40 = vmul.f32 %v1184_v39, %v3907_v30 }
 0x59a   : > { %v1189_v42 = vsel %vm1187_vm2, %v1188_v40, 0.0 }
 0x59b   : > { %v1190_v43 = vmul.f32 %v1189_v42, %v1186_v41 }
 0x59d   : > { %v1198_v44 = vadd.f32 %v1197_v36, %v1190_v43 }
 0x59f   : > { %2782 = vmatpush3.msra.mxu1 %v1198_v44 }
 0x5a0   : > { %2784 = vmatmul.mubr.msk.f32.vlgmr.msra.gmra.mrb[10].mxu1 %vm1199_vm1, %v3377_v19  ;;  %3062 = vmatprep.subr.bf16.mxu1 %v3374_v0 }
 0x5a1   : > { %3064 = vmatpush3.bf16.msk.msra.mxu1 %vm3693_vm8, %v3378_v20  ;;  %2823 = vmatprep.mubr.msk.f32.mxu1 %vm3375_vm0, %v3376_v1 }
 0x5a2   : > { %3065 = vmatprep.subr.bf16.mxu1 %v3374_v0 }
 0x5a5   : > { %3067 = vmatpush3.bf16.msk.msra.mxu1 %vm3705_vm11, %v3378_v20 }
 0x5a6   : > { %3068 = vmatprep.subr.bf16.mxu1 %v3374_v0 }
 0x5a9   : > { %3070 = vmatpush3.bf16.msk.msra.mxu1 %vm3722_vm14, %v3378_v20 }
 0x5aa   : > { %3071 = vmatprep.subr.bf16.mxu1 %v3374_v0 }
 0x5ad   : > { %3073 = vmatpush3.bf16.msk.msra.mxu1 %vm3736_vm5, %v3378_v20 }
 0x5ae   : > { %3074 = vmatprep.subr.bf16.mxu1 %v3374_v0 }
 0x5b1   : > { %3076 = vmatpush3.bf16.msk.msra.mxu1 %vm3750_vm9, %v3378_v20 }
 0x5b2   : > { %3077 = vmatprep.subr.bf16.mxu1 %v3374_v0 }
 0x5b5   : > { %3079 = vmatpush3.bf16.msk.msra.mxu1 %vm3764_vm13, %v3378_v20 }
 0x5b6   : > { %3080 = vmatprep.subr.bf16.mxu1 %v3374_v0 }
 0x5b9   : > { %3082 = vmatpush3.bf16.msk.msra.mxu1 %vm3778_vm6, %v3378_v20 }
 0x5ba   : > { %3083 = vmatprep.subr.bf16.mxu1 %v3374_v0 }
 0x5bd   : > { %3085 = vmatpush3.bf16.msk.msra.mxu1 %vm3790_vm12, %v3378_v20 }
 0x5be   : > { %2866 = vmatprep.subr.mxu1 %v3376_v1 }
 0x5c0   : > { %2824 = vmatmul.mubr.f32.vlgmr.msra.gmra.mrb[12].mxu1 %v1032_v18 }
 0x5c1   : > { %2868 = vmatprep.mubr.msk.f32.mxu1 %vm3375_vm0, %v3376_v1 }
 0x5f9   : > { %v1339_v45 = vpop.f32.mrb[12].mxu0 }
 0x5fa   : > { %1343 = vst [vmem:[%s3644_s20 + $0x6] sm:$0x1] %v1339_v45  ;;  %v2790_v47 = vpop.f32.mrb[13].mxu0 }
 0x673   : > { %v1268_v48 = vpop.f32.mrb[10].mxu1 }
 0x674   : > { %1272 = vst [vmem:[%s3644_s20 + $0x3] sm:$0x1] %v1268_v48  ;;  %v2785_v49 = vpop.f32.mrb[11].mxu1 }
 0x693   : > { %v1410_v51 = vpop.f32.mrb[12].mxu1 }
 0x694   : > { %v2825_v52 = vpop.f32.mrb[13].mxu1  ;;  %2827 = vmatpush3.msra.mxu0 %v1410_v51 }
 0x695   : > { %2829 = vmatmul.mubr.msk.f32.vlgmr.msra.gmra.mrb[14].mxu0 %vm1199_vm1, %v3839_v15  ;;  %3086 = vmatprep.subr.bf16.mxu0 %v3374_v0 }
 0x696   : > { %3088 = vmatpush3.bf16.msk.msra.mxu0 %vm3693_vm8, %v3378_v20  ;;  %2863 = vmatprep.mubr.msk.f32.mxu0 %vm3375_vm0, %v3376_v1 }
 0x697   : > { %3089 = vmatprep.subr.bf16.mxu0 %v3374_v0 }
 0x69a   : > { %3091 = vmatpush3.bf16.msk.msra.mxu0 %vm3705_vm11, %v3378_v20 }
 0x69b   : > { %3092 = vmatprep.subr.bf16.mxu0 %v3374_v0 }
 0x69e   : > { %3094 = vmatpush3.bf16.msk.msra.mxu0 %vm3722_vm14, %v3378_v20 }
 0x69f   : > { %3095 = vmatprep.subr.bf16.mxu0 %v3374_v0 }
 0x6a2   : > { %3097 = vmatpush3.bf16.msk.msra.mxu0 %vm3736_vm5, %v3378_v20 }
 0x6a3   : > { %3098 = vmatprep.subr.bf16.mxu0 %v3374_v0 }
 0x6a6   : > { %3100 = vmatpush3.bf16.msk.msra.mxu0 %vm3750_vm9, %v3378_v20 }
 0x6a7   : > { %3101 = vmatprep.subr.bf16.mxu0 %v3374_v0 }
 0x6aa   : > { %3103 = vmatpush3.bf16.msk.msra.mxu0 %vm3764_vm13, %v3378_v20 }
 0x6ab   : > { %3104 = vmatprep.subr.bf16.mxu0 %v3374_v0 }
 0x6ae   : > { %3106 = vmatpush3.bf16.msk.msra.mxu0 %vm3778_vm6, %v3378_v20 }
 0x6af   : > { %3107 = vmatprep.subr.bf16.mxu0 %v3374_v0 }
 0x6b2   : > { %3109 = vmatpush3.bf16.msk.msra.mxu0 %vm3790_vm12, %v3378_v20 }
 0x6b3   : > { %2876 = vmatprep.subr.mxu0 %v3376_v1 }
 0x6b5   : > { %2864 = vmatmul.mubr.f32.vlgmr.msra.gmra.mrb[16].mxu0 %v3907_v30 }
 0x6b6   : > { %2878 = vmatprep.mubr.msk.f32.mxu0 %vm3375_vm0, %v3376_v1 }
 0x768   : > { %v1482_v54 = vpop.f32.mrb[14].mxu0 }
 0x769   : > { %1626 = vrot.lane.b32.xlu0 %v1482_v54, %s3379_s0  ;;  %v2830_v55 = vpop.f32.mrb[15].mxu0  ;;  %v1636_v57 = vrot.slane %v1482_v54, 1 }
 0x76b   : > { %v1638_v59 = vsub.f32 %v1636_v57, %v1482_v54 }
 0x76d   : > { %v1639_v63 = vand.u32 2147483647, %v1638_v59 }
 0x788   : > { %v1552_v56 = vpop.f32.mrb[16].mxu0 }
 0x789   : > { %v2865_v58 = vpop.f32.mrb[17].mxu0  ;;  %2867 = vmatpush3.msra.mxu1 %v1552_v56 }
 0x78a   : > { %2869 = vmatmul.mubr.msk.f32.vlgmr.msra.gmra.mrb[14].mxu1 %vm1199_vm1, %v3839_v15  ;;  %2871 = vmatprep.subr.mxu1 %v3376_v1 }
 0x78b   : > { %2873 = vmatprep.mubr.msk.f32.mxu1 %vm3375_vm0, %v3376_v1 }
 0x7db   : > { %v1627_v6 = vpop.permute.xlu0 %1626 }
 0x7dc   : > { %v1630_v7 = vsub.f32 %v1627_v6, %v1482_v54 }
 0x7de   : > { %v1631_v12 = vand.u32 2147483647, %v1630_v7 }
 0x85d   : > { %v4010_v53 = vpop.f32.mrb[14].mxu1 }
 0x85e   : > { %v1637_v60 = vrot.slane %v4010_v53, 1  ;;  %1628 = vrot.lane.b32.xlu1 %v4010_v53, %s3379_s0  ;;  %v2870_v61 = vpop.f32.mrb[15].mxu1  ;;  %2877 = vmatpush3.msra.mxu0 %v4010_v53 }
 0x85f   : > { %2879 = vmatmul.mubr.msk.f32.vlgmr.msra.gmra.mrb[18].mxu0 %vm1199_vm1, %v3377_v19  ;;  %2916 = vmatprep.subr.mxu0 %v3376_v1 }
 0x860   : > { %v1641_v62 = vmul.f32 %v1637_v60, %v4010_v53  ;;  %2918 = vmatprep.mubr.msk.f32.mxu0 %vm3375_vm0, %v3376_v1 }
 0x862   : > { %v1642_v2 = vsel %vm1640_vm3, %v1641_v62, 0.0 }
 0x863   : > { %v1643_v8 = vmul.f32 %v1642_v2, %v1639_v63 }
 0x8d0   : > { %v1629_v9 = vpop.permute.xlu1 %1628 }
 0x8d1   : > { %v1633_v11 = vmul.f32 %v1629_v9, %v4010_v53 }
 0x8d3   : > { %v1634_v14 = vsel %vm1632_vm15, %v1633_v11, 0.0 }
 0x8d4   : > { %v1635_v3 = vmul.f32 %v1634_v14, %v1631_v12 }
 0x8d6   : > { %v1644_v17 = vadd.f32 %v1643_v8, %v1635_v3 }
 0x8d8   : > { %2872 = vmatpush3.msra.mxu1 %v1644_v17 }
 0x8d9   : > { %2874 = vmatmul.mubr.msk.f32.vlgmr.msra.gmra.mrb[16].mxu1 %vm1199_vm1, %v3377_v19  ;;  %3110 = vmatprep.subr.bf16.mxu1 %v3374_v0 }
 0x8da   : > { %3112 = vmatpush3.bf16.msk.msra.mxu1 %vm3693_vm8, %v3378_v20  ;;  %2913 = vmatprep.mubr.msk.f32.mxu1 %vm3375_vm0, %v3376_v1 }
 0x8db   : > { %3113 = vmatprep.subr.bf16.mxu1 %v3374_v0 }
 0x8de   : > { %3115 = vmatpush3.bf16.msk.msra.mxu1 %vm3705_vm11, %v3378_v20 }
 0x8df   : > { %3116 = vmatprep.subr.bf16.mxu1 %v3374_v0 }
 0x8e2   : > { %3118 = vmatpush3.bf16.msk.msra.mxu1 %vm3722_vm14, %v3378_v20 }
 0x8e3   : > { %3119 = vmatprep.subr.bf16.mxu1 %v3374_v0 }
 0x8e6   : > { %3121 = vmatpush3.bf16.msk.msra.mxu1 %vm3736_vm5, %v3378_v20 }
 0x8e7   : > { %3122 = vmatprep.subr.bf16.mxu1 %v3374_v0 }
 0x8ea   : > { %3124 = vmatpush3.bf16.msk.msra.mxu1 %vm3750_vm9, %v3378_v20 }
 0x8eb   : > { %3125 = vmatprep.subr.bf16.mxu1 %v3374_v0 }
 0x8ee   : > { %3127 = vmatpush3.bf16.msk.msra.mxu1 %vm3764_vm13, %v3378_v20 }
 0x8ef   : > { %3128 = vmatprep.subr.bf16.mxu1 %v3374_v0 }
 0x8f2   : > { %3130 = vmatpush3.bf16.msk.msra.mxu1 %vm3778_vm6, %v3378_v20 }
 0x8f3   : > { %3131 = vmatprep.subr.bf16.mxu1 %v3374_v0 }
 0x8f6   : > { %3133 = vmatpush3.bf16.msk.msra.mxu1 %vm3790_vm12, %v3378_v20 }
 0x8f7   : > { %2956 = vmatprep.subr.mxu1 %v3376_v1 }
 0x8f9   : > { %2914 = vmatmul.mubr.f32.vlgmr.msra.gmra.mrb[18].mxu1 %v1482_v54 }
 0x8fa   : > { %2958 = vmatprep.mubr.msk.f32.mxu1 %vm3375_vm0, %v3376_v1 }
 0x932   : > { %v1782_v18 = vpop.f32.mrb[18].mxu0 }
 0x933   : > { %1786 = vst [vmem:[%s3644_s20 + $0x7] sm:$0x1] %v1782_v18  ;;  %v2880_v22 = vpop.f32.mrb[19].mxu0 }
 0x9ac   : > { %v1711_v23 = vpop.f32.mrb[16].mxu1 }
 0x9ad   : > { %1715 = vst [vmem:[%s3644_s20 + $0x4] sm:$0x1] %v1711_v23  ;;  %v2875_v25 = vpop.f32.mrb[17].mxu1 }
 0x9cc   : > { %v1853_v26 = vpop.f32.mrb[18].mxu1 }
 0x9cd   : > { %v2915_v5 = vpop.f32.mrb[19].mxu1  ;;  %2917 = vmatpush3.msra.mxu0 %v1853_v26 }
 0x9ce   : > { %2919 = vmatmul.mubr.msk.f32.vlgmr.msra.gmra.mrb[20].mxu0 %vm1199_vm1, %v3839_v15  ;;  %3134 = vmatprep.subr.bf16.mxu0 %v3374_v0 }
 0x9cf   : > { %3136 = vmatpush3.bf16.msk.msra.mxu0 %vm3693_vm8, %v3378_v20  ;;  %2953 = vmatprep.mubr.msk.f32.mxu0 %vm3375_vm0, %v3376_v1  ;;  %vm2081_vm8 = vcmp.lt.s32.totalorder %v3663_v50, 1 }
 0x9d0   : > { %3137 = vmatprep.subr.bf16.mxu0 %v3374_v0 }
 0x9d3   : > { %3139 = vmatpush3.bf16.msk.msra.mxu0 %vm3705_vm11, %v3378_v20 }
 0x9d4   : > { %3140 = vmatprep.subr.bf16.mxu0 %v3374_v0 }
 0x9d7   : > { %3142 = vmatpush3.bf16.msk.msra.mxu0 %vm3722_vm14, %v3378_v20 }
 0x9d8   : > { %3143 = vmatprep.subr.bf16.mxu0 %v3374_v0 }
 0x9db   : > { %3145 = vmatpush3.bf16.msk.msra.mxu0 %vm3736_vm5, %v3378_v20 }
 0x9dc   : > { %3146 = vmatprep.subr.bf16.mxu0 %v3374_v0 }
 0x9df   : > { %3148 = vmatpush3.bf16.msk.msra.mxu0 %vm3750_vm9, %v3378_v20 }
 0x9e0   : > { %3149 = vmatprep.subr.bf16.mxu0 %v3374_v0 }
 0x9e3   : > { %3151 = vmatpush3.bf16.msk.msra.mxu0 %vm3764_vm13, %v3378_v20 }
 0x9e4   : > { %3152 = vmatprep.subr.bf16.mxu0 %v3374_v0 }
 0x9e7   : > { %3154 = vmatpush3.bf16.msk.msra.mxu0 %vm3778_vm6, %v3378_v20 }
 0x9e8   : > { %3155 = vmatprep.subr.bf16.mxu0 %v3374_v0 }
 0x9eb   : > { %3157 = vmatpush3.bf16.msk.msra.mxu0 %vm3790_vm12, %v3378_v20 }
 0x9ec   : > { %2966 = vmatprep.subr.mxu0 %v3376_v1 }
 0x9ee   : > { %2954 = vmatmul.mubr.f32.vlgmr.msra.gmra.mrb[22].mxu0 %v4010_v53 }
 0x9ef   : > { %2968 = vmatprep.mubr.msk.f32.mxu0 %vm3375_vm0, %v3376_v1 }
 0xaa1   : > { %v1923_v4 = vpop.f32.mrb[20].mxu0 }
 0xaa2   : > { %2067 = vrot.lane.b32.xlu0 %v1923_v4, %s3379_s0  ;;  %v2920_v10 = vpop.f32.mrb[21].mxu0  ;;  %v2077_v0 = vrot.slane %v1923_v4, 1 }
 0xaa4   : > { %v2079_v20 = vsub.f32 %v2077_v0, %v1923_v4 }
 0xac1   : > { %v1993_v13 = vpop.f32.mrb[22].mxu0 }
 0xac2   : > { %v2955_v16 = vpop.f32.mrb[23].mxu0  ;;  %2957 = vmatpush3.msra.mxu1 %v1993_v13 }
 0xac3   : > { %2959 = vmatmul.mubr.msk.f32.vlgmr.msra.gmra.mrb[20].mxu1 %vm1199_vm1, %v3839_v15  ;;  %2961 = vmatprep.subr.mxu1 %v3376_v1  ;;  %v2080_v15 = vand.u32 2147483647, %v2079_v20 }
 0xac4   : > { %2963 = vmatprep.mubr.msk.f32.mxu1 %vm3375_vm0, %v3376_v1  ;;  %vm2073_vm0 = vcmp.lt.s32.totalorder %v3659_v46, 1 }
 0xb14   : > { %v2068_v1 = vpop.permute.xlu0 %2067 }
 0xb15   : > { %v2071_v31 = vsub.f32 %v2068_v1, %v1923_v4 }
 0xb17   : > { %v2072_v34 = vand.u32 2147483647, %v2071_v31 }
 0xb96   : > { %v2063_v21 = vpop.f32.mrb[20].mxu1 }
 0xb97   : > { %v2078_v24 = vrot.slane %v2063_v21, 1  ;;  %2069 = vrot.lane.b32.xlu1 %v2063_v21, %s3379_s0  ;;  %v2960_v27 = vpop.f32.mrb[21].mxu1  ;;  %2967 = vmatpush3.msra.mxu0 %v2063_v21 }
 0xb98   : > { %2969 = vmatmul.mubr.msk.f32.vlgmr.msra.gmra.mrb[24].mxu0 %vm1199_vm1, %v3377_v19 }
 0xb99   : > { %v2082_v28 = vmul.f32 %v2078_v24, %v2063_v21 }
 0xb9b   : > { %v2083_v29 = vsel %vm2081_vm8, %v2082_v28, 0.0 }
 0xb9c   : > { %v2084_v30 = vmul.f32 %v2083_v29, %v2080_v15 }
 0xc09   : > { %v2070_v32 = vpop.permute.xlu1 %2069 }
 0xc0a   : > { %v2074_v33 = vmul.f32 %v2070_v32, %v2063_v21 }
 0xc0c   : > { %v2075_v50 = vsel %vm2073_vm0, %v2074_v33, 0.0 }
 0xc0d   : > { %v2076_v35 = vmul.f32 %v2075_v50, %v2072_v34 }
 0xc0f   : > { %v2085_v36 = vadd.f32 %v2084_v30, %v2076_v35 }
 0xc11   : > { %2962 = vmatpush3.msra.mxu1 %v2085_v36 }
 0xc12   : > { %2964 = vmatmul.mubr.msk.f32.vlgmr.msra.gmra.mrb[22].mxu1 %vm1199_vm1, %v3377_v19 }
 0xc6b   : > { %v2223_v37 = vpop.f32.mrb[24].mxu0 }
 0xc6c   : > { %2227 = vst [vmem:[%s3644_s20 + $0x8] sm:$0x1] %v2223_v37  ;;  %v2970_v38 = vpop.f32.mrb[25].mxu0 }
 0xce5   : > { %v2152_v46 = vpop.f32.mrb[22].mxu1 }
 0xce6   : > { %2156 = vst [vmem:[%s3644_s20 + $0x5] sm:$0x1] %v2152_v46  ;;  %v2965_v39 = vpop.f32.mrb[23].mxu1 }
 0xce7   : > { %3311 = shalt.err (!%p3308_p3)
}
 0xce8   : > { %s3312_s20 = scalar_lea.hbm %s4125_s17, 256  ;;  %s3316_s8 = scalar_lea.hbm %s4174_s2, 512 }
 0xce9   : > { %p3313_p8 = scmp.ne.s32.totalorder %s4125_s17, %s3312_s20  ;;  %p3317_p4 = scmp.lt.u32.totalorder %s4125_s17, %s4174_s2 }
 0xcea   : > { %p3318_p6 = scmp.lt.u32.totalorder %s3316_s8, %s3312_s20  ;;  %p3320_p1 = scmp.lt.u32.totalorder %s3312_s20, %s4125_s17 }
 0xceb   : > { %p3314_p0 = pnand %p3313_p8, %p4204_p12 }
 0xcec   : > { %p3319_p13 = por %p3318_p6, %p3317_p4 }
 0xced   : > { %p3315_p2 = pneg %p3314_p0 }
 0xcee   : > { %p3321_p10 = por %p3320_p1, %p3319_p13 }
 0xcf0   : > { %p3322_p5 = pnand %p3321_p10, %p3315_p2 }
 0xcf2   : > { %3325 = shalt.err (!%p3322_p5)
}
 0xcf3   : > { %s3381_s3 = smov 128   ;;  %s3382_s19 = smov 8  }
 0xcf4   : > { %3174 = dma.vmem_to_hbm [thread:$0]  (%p4204_p12), %s4127_s5, 256, %s4125_s17, %s2229_s28, %s3381_s3, %s3381_s3, %s3382_s19  }
 0xcf5 PF: > { %s2257_s23 = sand.u32 1, %s3356_s9   ;;  %p4205_p7 = scmp.ne.s32.totalorder %s4182_s22, 0 }
 0xcf6   : > { %p4206_p9 = scmp.ge.s32.totalorder %s3368_s12, 2  ;;  %s2258_s29 = scalar_lea.sflag [#allocation4], %s2257_s23 }
 0xcf8   : > { %p3184_p11 = pnand %p4206_p9, %p4205_p7 }
 0xcfa   : > { %3351 = dma.done.wait (!%p3184_p11), %s2258_s29, 256  }
 0xcfb   : > { %3353 = vsyncadd (!%p3184_p11), %s2258_s29, 4294967040  ;;  %p18_p3 = scmp.ge.s32.totalorder %s3423_s15, 4   ;;  %s4207_s9 = smov %s3360_s10 }
 0xcfc   : > { %s4208_s10 = smov %s3364_s11  ;;  %s4209_s11 = smov %s3435_s18 }
 0xcfd   : > { %s4210_s12 = smov %s3423_s15  ;;  %20 = sbr.rel (!%p18_p3) target bundleno = 10 (0xa), region = 86 }
 0xd04   :  { %2263 = vsyncpa [#allocation3], 1 }
 0xd05   :  { %2265 = vsyncpa [#allocation3 + $0x1], 1 }
 0xd06   :  { %2266 = vsyncpa [#allocation6], 1 }
 0xd07   :  { %2268 = vsyncpa [#allocation6 + $0x1], 1 }
 0xd08   :  { %2269 = vsyncpa [#allocation4], 1 }
 0xd09   :  { %2271 = vsyncpa [#allocation4 + $0x1], 1 }

</bundles_post_ra>
